<compile_context>
chip_gen: v5e
topology: v5e:2x2
jax: 0.10.0
libtpu: 0.0.40
codegen_flags: <defaults>
</compile_context>

<pallas_src>
import functools

import jax
import jax.numpy as jnp
from jax import lax
from jax.experimental import pallas as pl
from jax.experimental.pallas import tpu as pltpu


# ----------------------------- fused attention kernel ------------------------
def _attention_kernel(x_ref, wqkv_ref, wout_ref, bout_ref, o_ref,
                      qkv_ref, ctx_ref, *, bt, seq, heads, dim_head):
    # x_ref:    (Bt, S, D)       f32 batch tile
    # wqkv_ref: (D, 3*inner)     bf16, VMEM-resident across grid (const index_map)
    # wout_ref: (inner, D)       bf16, VMEM-resident across grid
    # bout_ref: (1, D)           f32, VMEM-resident across grid
    # o_ref:    (Bt, S, D)       f32
    # qkv_ref:  (Bt*S, 3*inner)  bf16 scratch
    # ctx_ref:  (Bt*S, inner)    bf16 scratch
    inner = heads * dim_head
    rows = bt * seq
    dim = x_ref.shape[-1]

    # --- QKV projection: bf16 MXU operands, f32 accumulation, M = Bt*S rows ---
    x = x_ref[...].reshape(rows, dim).astype(jnp.bfloat16)
    qkv_ref[...] = jnp.dot(x, wqkv_ref[...],
                           preferred_element_type=jnp.float32).astype(jnp.bfloat16)

    # --- per-head softmax attention, batched over the Bt sequences ------------
    # heads is small -> static unroll keeps all lane slices static / 128-aligned.
    # (If heads grows beyond ~4-8, switch to lax.fori_loop with pl.ds slices.)
    for h in range(heads):
        q = qkv_ref[:, h * dim_head:(h + 1) * dim_head]
        k = qkv_ref[:, inner + h * dim_head: inner + (h + 1) * dim_head]
        v = qkv_ref[:, 2 * inner + h * dim_head: 2 * inner + (h + 1) * dim_head]
        q = q.reshape(bt, seq, dim_head)          # bf16, scale already folded in
        k = k.reshape(bt, seq, dim_head)
        v = v.reshape(bt, seq, dim_head)

        # scores (Bt, S, S), f32 accumulation on the MXU
        s = jnp.einsum("bqd,bkd->bqk", q, k, preferred_element_type=jnp.float32)
        m = jnp.max(s, axis=-1, keepdims=True)
        p = jnp.exp(s - m)                                          # unnormalized
        inv = pl.reciprocal(jnp.sum(p, axis=-1, keepdims=True), approx=True)

        # attn @ v with bf16 probabilities; normalize the small (Bt,S,Dh) result.
        ctx = jnp.einsum("bqk,bkd->bqd", p.astype(jnp.bfloat16), v,
                         preferred_element_type=jnp.float32)
        ctx_ref[:, h * dim_head:(h + 1) * dim_head] = (
            (ctx * inv).reshape(rows, dim_head).astype(jnp.bfloat16))

    # --- output projection (to_out Linear; dropout p=0 -> identity) -----------
    out = jnp.dot(ctx_ref[...], wout_ref[...], preferred_element_type=jnp.float32)
    out = out + bout_ref[...]                     # (rows, D) + (1, D) broadcast, f32
    o_ref[...] = out.reshape(bt, seq, dim).astype(o_ref.dtype)


def _pick_block_batch(batch, seq):
    """Smallest divisor of `batch` giving >=128 rows per grid step (full MXU M
    occupancy) while staying <=512 rows; otherwise the largest <=512 rows."""
    best = 1
    for bt in range(1, batch + 1):
        if batch % bt:
            continue
        rows = bt * seq
        if rows <= 512:
            best = bt
            if rows >= 128:
                return bt
    return best


def prepare_attention_params(w_qkv, w_out, b_out, *, heads, dim_head):
    """One-time parameter transform (outside the per-call path):
       - fold the 1/sqrt(dim_head) softmax scale into the Q columns of W_qkv
       - cast matmul weights to bf16 (full-rate MXU operands, f32 accumulation)
    """
    inner = heads * dim_head
    scale = float(dim_head) ** -0.5
    w_qkv_scaled = jnp.concatenate([w_qkv[:, :inner] * scale, w_qkv[:, inner:]],
                                   axis=-1)
    return (w_qkv_scaled.astype(jnp.bfloat16),
            w_out.astype(jnp.bfloat16),
            b_out.astype(jnp.float32).reshape(1, -1))


def attention_forward(x, w_qkv, w_out, b_out, *, heads, dim_head):
    """x: (B, S, D) -> (B, S, D). Matches Attention.forward (dropout=0.0).

    w_qkv / w_out / b_out must come from prepare_attention_params (bf16 weights,
    scale folded into the Q projection, bias reshaped to (1, D))."""
    B, S, D = x.shape
    inner = heads * dim_head
    assert w_qkv.shape == (D, 3 * inner)
    assert w_out.shape == (inner, D)
    assert b_out.shape == (1, D)

    bt = _pick_block_batch(B, S)
    grid = (B // bt,)

    kernel = functools.partial(_attention_kernel, bt=bt, seq=S,
                               heads=heads, dim_head=dim_head)

    flops = int(2 * B * S * (D * 3 * inner          # qkv projection
                             + 2 * S * inner        # q@k^T and attn@v
                             + inner * D))          # output projection
    bytes_accessed = int(4 * 2 * B * S * D                       # x in, out (f32)
                         + 2 * (D * 3 * inner + inner * D)       # bf16 weights
                         + 4 * D)                                # bias

    return pl.pallas_call(
        kernel,
        out_shape=jax.ShapeDtypeStruct((B, S, D), x.dtype),
        grid=grid,
        in_specs=[
            pl.BlockSpec((bt, S, D), lambda i: (i, 0, 0)),        # x tile
            pl.BlockSpec((D, 3 * inner), lambda i: (0, 0)),       # W_qkv resident
            pl.BlockSpec((inner, D), lambda i: (0, 0)),           # W_out resident
            pl.BlockSpec((1, D), lambda i: (0, 0)),               # b_out resident
        ],
        out_specs=pl.BlockSpec((bt, S, D), lambda i: (i, 0, 0)),
        scratch_shapes=[
            pltpu.VMEM((bt * S, 3 * inner), jnp.bfloat16),        # qkv (bf16)
            pltpu.VMEM((bt * S, inner), jnp.bfloat16),            # ctx (bf16)
        ],
        compiler_params=pltpu.CompilerParams(
            dimension_semantics=("parallel",)),                   # megacore on v7x
        cost_estimate=pl.CostEstimate(
            flops=flops,
            transcendentals=int(B * heads * S * S),
            bytes_accessed=bytes_accessed),
    )(x, w_qkv, w_out, b_out)


# ------------------------------- pure-JAX reference ---------------------------
def attention_ref(x, w_qkv, w_out, b_out, *, heads, dim_head):
    B, S, D = x.shape
    inner = heads * dim_head
    scale = float(dim_head) ** -0.5
    qkv = jnp.einsum("bsd,de->bse", x, w_qkv)
    q, k, v = jnp.split(qkv, 3, axis=-1)

    def to_heads(t):  # 'b n (h d) -> b h n d'
        return t.reshape(B, S, heads, dim_head).transpose(0, 2, 1, 3)

    q, k, v = map(to_heads, (q, k, v))
    dots = jnp.einsum("bhid,bhjd->bhij", q, k) * scale
    attn = jax.nn.softmax(dots, axis=-1)
    out = jnp.einsum("bhij,bhjd->bhid", attn, v)
    out = out.transpose(0, 2, 1, 3).reshape(B, S, inner)   # 'b h n d -> b n (h d)'
    return jnp.einsum("bsi,id->bsd", out, w_out) + b_out


if __name__ == "__main__":
    # Small but lane-dense / MXU-aligned shapes; Bt=8 -> 128 rows per grid step.
    B, S, D = 16, 16, 128
    heads, dim_head = 2, 128          # inner_dim = 256, project_out = True
    inner = heads * dim_head

    key = jax.random.PRNGKey(0)
    kx, kqkv, kw, kb = jax.random.split(key, 4)

    x = jax.random.normal(kx, (B, S, D), dtype=jnp.float32)
    w_qkv = jax.random.normal(kqkv, (D, 3 * inner), dtype=jnp.float32) / jnp.sqrt(D)
    w_out = jax.random.normal(kw, (inner, D), dtype=jnp.float32) / jnp.sqrt(inner)
    b_out = 0.01 * jax.random.normal(kb, (D,), dtype=jnp.float32)

    params = prepare_attention_params(w_qkv, w_out, b_out,
                                      heads=heads, dim_head=dim_head)
    out = attention_forward(x, *params, heads=heads, dim_head=dim_head)
    out = jax.block_until_ready(out)
    assert out.shape == (B, S, D), out.shape

    # Reference with matching operand quantization: the kernel deliberately feeds
    # the MXU bf16 operands (f32 accumulation), so compare against bf16-rounded
    # inputs/weights; remaining diffs are f32-accumulation / approx-reciprocal /
    # intermediate bf16 rounding, well inside 2e-2.
    bf = lambda a: a.astype(jnp.bfloat16).astype(jnp.float32)
    ref = attention_ref(bf(x), bf(w_qkv), bf(w_out), b_out,
                        heads=heads, dim_head=dim_head)
    max_err = float(jnp.max(jnp.abs(out - ref)))
    assert jnp.allclose(out, ref, atol=3e-2, rtol=3e-2), max_err

    print("KERNEL_OK")
</pallas_src>

<mosaic_0001>
module attributes {stable_mosaic.version = 11 : i64} {
  func.func @_attention_kernel(%arg0: i32, %arg1: memref<8x16x128xf32, #tpu.memory_space<vmem>>, %arg2: memref<128x768xbf16, #tpu.memory_space<vmem>>, %arg3: memref<256x128xbf16, #tpu.memory_space<vmem>>, %arg4: memref<1x128xf32, #tpu.memory_space<vmem>>, %arg5: memref<8x16x128xf32, #tpu.memory_space<vmem>>, %arg6: memref<128x768xbf16, #tpu.memory_space<vmem>>, %arg7: memref<128x256xbf16, #tpu.memory_space<vmem>>) attributes {dimension_semantics = [#tpu.dimension_semantics<parallel>], iteration_bounds = array<i64: 2>, scalar_prefetch = 0 : i64, scratch_operands = 2 : i64, tpu.core_type = #tpu.core_type<tc>, window_params = [{transform_indices = @transform_0, window_bounds = array<i64: 8, 16, 128>}, {pipeline_mode = #tpu.pipeline_mode<synchronous>, transform_indices = @transform_1, window_bounds = array<i64: 128, 768>}, {pipeline_mode = #tpu.pipeline_mode<synchronous>, transform_indices = @transform_2, window_bounds = array<i64: 256, 128>}, {pipeline_mode = #tpu.pipeline_mode<synchronous>, transform_indices = @transform_3, window_bounds = array<i64: 1, 128>}, {transform_indices = @transform_4, window_bounds = array<i64: 8, 16, 128>}]} {
    %c0 = arith.constant 0 : index
    %c0_0 = arith.constant 0 : index
    %c0_1 = arith.constant 0 : index
    %0 = vector.load %arg1[%c0, %c0_0, %c0_1] : memref<8x16x128xf32, #tpu.memory_space<vmem>>, vector<8x16x128xf32>
    %1 = vector.shape_cast %0 : vector<8x16x128xf32> to vector<128x128xf32>
    %2 = arith.truncf %1 : vector<128x128xf32> to vector<128x128xbf16>
    %c0_2 = arith.constant 0 : index
    %c0_3 = arith.constant 0 : index
    %3 = vector.load %arg2[%c0_2, %c0_3] : memref<128x768xbf16, #tpu.memory_space<vmem>>, vector<128x768xbf16>
    %cst = arith.constant dense<0.000000e+00> : vector<128x768xf32>
    %4 = tpu.matmul %2, %3, %cst {dimension_numbers = #tpu.dot_dimension_numbers<[1], [0], [0], [1], [0, 0, 1, 1], [], []>} : vector<128x128xbf16>, vector<128x768xbf16>, vector<128x768xf32> -> vector<128x768xf32>
    %5 = arith.truncf %4 : vector<128x768xf32> to vector<128x768xbf16>
    %c0_4 = arith.constant 0 : index
    %c0_5 = arith.constant 0 : index
    %6 = vector.load %arg6[%c0_4, %c0_5] : memref<128x768xbf16, #tpu.memory_space<vmem>>, vector<128x768xbf16>
    tpu.vector_store %arg6[%c0_4, %c0_5], %5 {strides = array<i32>} : memref<128x768xbf16, #tpu.memory_space<vmem>>, vector<128x768xbf16>,
    %c0_6 = arith.constant 0 : index
    %c0_7 = arith.constant 0 : index
    %7 = vector.load %arg6[%c0_6, %c0_7] : memref<128x768xbf16, #tpu.memory_space<vmem>>, vector<128x128xbf16>
    %c0_8 = arith.constant 0 : index
    %c256 = arith.constant 256 : index
    %8 = vector.load %arg6[%c0_8, %c256] : memref<128x768xbf16, #tpu.memory_space<vmem>>, vector<128x128xbf16>
    %c0_9 = arith.constant 0 : index
    %c512 = arith.constant 512 : index
    %9 = vector.load %arg6[%c0_9, %c512] : memref<128x768xbf16, #tpu.memory_space<vmem>>, vector<128x128xbf16>
    %10 = vector.shape_cast %7 : vector<128x128xbf16> to vector<8x16x128xbf16>
    %11 = vector.shape_cast %8 : vector<128x128xbf16> to vector<8x16x128xbf16>
    %12 = vector.shape_cast %9 : vector<128x128xbf16> to vector<8x16x128xbf16>
    "tpu.trace_start"() <{level = 10 : i32, message = "bqd,bkd->bqk"}> : () -> ()
    %cst_10 = arith.constant dense<0.000000e+00> : vector<8x16x16xf32>
    %13 = tpu.matmul %10, %11, %cst_10 {dimension_numbers = #tpu.dot_dimension_numbers<[2], [2], [1], [1], [0, 0, 0, 1, 1, 1], [0], [0]>} : vector<8x16x128xbf16>, vector<8x16x128xbf16>, vector<8x16x16xf32> -> vector<8x16x16xf32>
    "tpu.trace_stop"() : () -> ()
    %cst_11 = arith.constant dense<0xFF800000> : vector<8x16xf32>
    %14 = vector.multi_reduction <maximumf>, %13, %cst_11 [2] : vector<8x16x16xf32> to vector<8x16xf32>
    %15 = vector.shape_cast %14 : vector<8x16xf32> to vector<8x16x1xf32>
    %16 = vector.broadcast %15 : vector<8x16x1xf32> to vector<8x16x16xf32>
    %17 = arith.subf %13, %16 : vector<8x16x16xf32>
    %18 = math.exp %17 : vector<8x16x16xf32>
    %cst_12 = arith.constant dense<0.000000e+00> : vector<8x16xf32>
    %19 = vector.multi_reduction <add>, %18, %cst_12 [2] : vector<8x16x16xf32> to vector<8x16xf32>
    %20 = vector.shape_cast %19 : vector<8x16xf32> to vector<8x16x1xf32>
    %21 = tpu.reciprocal %20 {approx = true} : vector<8x16x1xf32> -> vector<8x16x1xf32>
    %22 = arith.truncf %18 : vector<8x16x16xf32> to vector<8x16x16xbf16>
    "tpu.trace_start"() <{level = 10 : i32, message = "bqk,bkd->bqd"}> : () -> ()
    %cst_13 = arith.constant dense<0.000000e+00> : vector<8x16x128xf32>
    %23 = tpu.matmul %22, %12, %cst_13 {dimension_numbers = #tpu.dot_dimension_numbers<[2], [1], [1], [2], [0, 0, 0, 1, 1, 2], [0], [0]>} : vector<8x16x16xbf16>, vector<8x16x128xbf16>, vector<8x16x128xf32> -> vector<8x16x128xf32>
    "tpu.trace_stop"() : () -> ()
    %24 = vector.broadcast %21 : vector<8x16x1xf32> to vector<8x16x128xf32>
    %25 = arith.mulf %23, %24 : vector<8x16x128xf32>
    %26 = vector.shape_cast %25 : vector<8x16x128xf32> to vector<128x128xf32>
    %27 = arith.truncf %26 : vector<128x128xf32> to vector<128x128xbf16>
    %c0_14 = arith.constant 0 : index
    %c0_15 = arith.constant 0 : index
    %28 = vector.load %arg7[%c0_14, %c0_15] : memref<128x256xbf16, #tpu.memory_space<vmem>>, vector<128x128xbf16>
    tpu.vector_store %arg7[%c0_14, %c0_15], %27 {strides = array<i32>} : memref<128x256xbf16, #tpu.memory_space<vmem>>, vector<128x128xbf16>,
    %c0_16 = arith.constant 0 : index
    %c128 = arith.constant 128 : index
    %29 = vector.load %arg6[%c0_16, %c128] : memref<128x768xbf16, #tpu.memory_space<vmem>>, vector<128x128xbf16>
    %c0_17 = arith.constant 0 : index
    %c384 = arith.constant 384 : index
    %30 = vector.load %arg6[%c0_17, %c384] : memref<128x768xbf16, #tpu.memory_space<vmem>>, vector<128x128xbf16>
    %c0_18 = arith.constant 0 : index
    %c640 = arith.constant 640 : index
    %31 = vector.load %arg6[%c0_18, %c640] : memref<128x768xbf16, #tpu.memory_space<vmem>>, vector<128x128xbf16>
    %32 = vector.shape_cast %29 : vector<128x128xbf16> to vector<8x16x128xbf16>
    %33 = vector.shape_cast %30 : vector<128x128xbf16> to vector<8x16x128xbf16>
    %34 = vector.shape_cast %31 : vector<128x128xbf16> to vector<8x16x128xbf16>
    "tpu.trace_start"() <{level = 10 : i32, message = "bqd,bkd->bqk"}> : () -> ()
    %cst_19 = arith.constant dense<0.000000e+00> : vector<8x16x16xf32>
    %35 = tpu.matmul %32, %33, %cst_19 {dimension_numbers = #tpu.dot_dimension_numbers<[2], [2], [1], [1], [0, 0, 0, 1, 1, 1], [0], [0]>} : vector<8x16x128xbf16>, vector<8x16x128xbf16>, vector<8x16x16xf32> -> vector<8x16x16xf32>
    "tpu.trace_stop"() : () -> ()
    %cst_20 = arith.constant dense<0xFF800000> : vector<8x16xf32>
    %36 = vector.multi_reduction <maximumf>, %35, %cst_20 [2] : vector<8x16x16xf32> to vector<8x16xf32>
    %37 = vector.shape_cast %36 : vector<8x16xf32> to vector<8x16x1xf32>
    %38 = vector.broadcast %37 : vector<8x16x1xf32> to vector<8x16x16xf32>
    %39 = arith.subf %35, %38 : vector<8x16x16xf32>
    %40 = math.exp %39 : vector<8x16x16xf32>
    %cst_21 = arith.constant dense<0.000000e+00> : vector<8x16xf32>
    %41 = vector.multi_reduction <add>, %40, %cst_21 [2] : vector<8x16x16xf32> to vector<8x16xf32>
    %42 = vector.shape_cast %41 : vector<8x16xf32> to vector<8x16x1xf32>
    %43 = tpu.reciprocal %42 {approx = true} : vector<8x16x1xf32> -> vector<8x16x1xf32>
    %44 = arith.truncf %40 : vector<8x16x16xf32> to vector<8x16x16xbf16>
    "tpu.trace_start"() <{level = 10 : i32, message = "bqk,bkd->bqd"}> : () -> ()
    %cst_22 = arith.constant dense<0.000000e+00> : vector<8x16x128xf32>
    %45 = tpu.matmul %44, %34, %cst_22 {dimension_numbers = #tpu.dot_dimension_numbers<[2], [1], [1], [2], [0, 0, 0, 1, 1, 2], [0], [0]>} : vector<8x16x16xbf16>, vector<8x16x128xbf16>, vector<8x16x128xf32> -> vector<8x16x128xf32>
    "tpu.trace_stop"() : () -> ()
    %46 = vector.broadcast %43 : vector<8x16x1xf32> to vector<8x16x128xf32>
    %47 = arith.mulf %45, %46 : vector<8x16x128xf32>
    %48 = vector.shape_cast %47 : vector<8x16x128xf32> to vector<128x128xf32>
    %49 = arith.truncf %48 : vector<128x128xf32> to vector<128x128xbf16>
    %c0_23 = arith.constant 0 : index
    %c128_24 = arith.constant 128 : index
    %50 = vector.load %arg7[%c0_23, %c128_24] : memref<128x256xbf16, #tpu.memory_space<vmem>>, vector<128x128xbf16>
    tpu.vector_store %arg7[%c0_23, %c128_24], %49 {strides = array<i32>} : memref<128x256xbf16, #tpu.memory_space<vmem>>, vector<128x128xbf16>,
    %c0_25 = arith.constant 0 : index
    %c0_26 = arith.constant 0 : index
    %51 = vector.load %arg7[%c0_25, %c0_26] : memref<128x256xbf16, #tpu.memory_space<vmem>>, vector<128x256xbf16>
    %c0_27 = arith.constant 0 : index
    %c0_28 = arith.constant 0 : index
    %52 = vector.load %arg3[%c0_27, %c0_28] : memref<256x128xbf16, #tpu.memory_space<vmem>>, vector<256x128xbf16>
    %cst_29 = arith.constant dense<0.000000e+00> : vector<128x128xf32>
    %53 = tpu.matmul %51, %52, %cst_29 {dimension_numbers = #tpu.dot_dimension_numbers<[1], [0], [0], [1], [0, 0, 1, 1], [], []>} : vector<128x256xbf16>, vector<256x128xbf16>, vector<128x128xf32> -> vector<128x128xf32>
    %c0_30 = arith.constant 0 : index
    %c0_31 = arith.constant 0 : index
    %54 = vector.load %arg4[%c0_30, %c0_31] : memref<1x128xf32, #tpu.memory_space<vmem>>, vector<1x128xf32>
    %55 = vector.broadcast %54 : vector<1x128xf32> to vector<128x128xf32>
    %56 = arith.addf %53, %55 : vector<128x128xf32>
    %57 = vector.shape_cast %56 : vector<128x128xf32> to vector<8x16x128xf32>
    %c0_32 = arith.constant 0 : index
    %c0_33 = arith.constant 0 : index
    %c0_34 = arith.constant 0 : index
    %58 = vector.load %arg5[%c0_32, %c0_33, %c0_34] : memref<8x16x128xf32, #tpu.memory_space<vmem>>, vector<8x16x128xf32>
    tpu.vector_store %arg5[%c0_32, %c0_33, %c0_34], %57 {strides = array<i32>} : memref<8x16x128xf32, #tpu.memory_space<vmem>>, vector<8x16x128xf32>,
    return
  }
  func.func @transform_0(%arg0: i32) -> (i32, i32, i32) {
    %c0_i32 = arith.constant 0 : i32
    %c0_i32_0 = arith.constant 0 : i32
    %c0_i32_1 = arith.constant 0 : i32
    return %arg0, %c0_i32, %c0_i32_0 : i32, i32, i32
  }
  func.func @transform_1(%arg0: i32) -> (i32, i32) {
    %c0_i32 = arith.constant 0 : i32
    %c0_i32_0 = arith.constant 0 : i32
    %c0_i32_1 = arith.constant 0 : i32
    return %c0_i32, %c0_i32_0 : i32, i32
  }
  func.func @transform_2(%arg0: i32) -> (i32, i32) {
    %c0_i32 = arith.constant 0 : i32
    %c0_i32_0 = arith.constant 0 : i32
    %c0_i32_1 = arith.constant 0 : i32
    return %c0_i32, %c0_i32_0 : i32, i32
  }
  func.func @transform_3(%arg0: i32) -> (i32, i32) {
    %c0_i32 = arith.constant 0 : i32
    %c0_i32_0 = arith.constant 0 : i32
    %c0_i32_1 = arith.constant 0 : i32
    return %c0_i32, %c0_i32_0 : i32, i32
  }
  func.func @transform_4(%arg0: i32) -> (i32, i32, i32) {
    %c0_i32 = arith.constant 0 : i32
    %c0_i32_0 = arith.constant 0 : i32
    %c0_i32_1 = arith.constant 0 : i32
    return %arg0, %c0_i32, %c0_i32_0 : i32, i32, i32
  }
}

</mosaic_0001>

<bundles_post_ra>
// kernel: tpu_custom_call.1
= control target key start
LH: loop header
LB: loop body
LE: loop exit
PB: predicated region body
PF: predicated region fallthrough
CT: control target
= control target key end

     0   :  { %9 = vsyncpa [#allocation5], 0  ;;  %s4551_s0 = inlined_call_operand.hbm [shape: f32[16,16,128], index: 0, kind: input, shape index: {}]   ;;  %s4552_s1 = inlined_call_operand.hbm [shape: bf16[128,768], index: 1, kind: input, shape index: {}]   ;;  %s4553_s2 = inlined_call_operand.hbm [shape: bf16[256,128], index: 2, kind: input, shape index: {}]   ;;  %s4554_s3 = inlined_call_operand.vmem [shape: f32[1,128], index: 3, kind: input, shape index: {}]   ;;  %s4555_s4 = inlined_call_operand.hbm [shape: f32[16,16,128], index: 4, kind: output, shape index: {}]  }
   0x1   :  { %11 = vsyncpa [#allocation5 + $0x1], 0 }
   0x2   :  { %12 = vsyncpa [#allocation8], 0 }
   0x3   :  { %13 = vsyncpa [#allocation6], 0 }
   0x4   :  { %15 = vsyncpa [#allocation6 + $0x1], 0  ;;  %s3914_s15 = smov 0   ;;  %s3916_s16 = smov 0  }
   0x5   :  { %s3918_s17 = smov 0   ;;  %s3920_s18 = smov 0  }
   0x6 LB: > { %s3935_s19 = sadd.s32 4294967295, %s3877_s18   ;;  %s2817_s20 = sadd.s32 4294967294, %s3877_s18   ;;  %s3877_s18 = sphi %s3920_s18, %s4565_s18   ;;  %s3873_s17 = sphi %s3918_s17, %s4564_s17   ;;  %s3869_s16 = sphi %s3916_s16, %s4563_s16   ;;  %s3865_s15 = sphi %s3914_s15, %s4562_s15  }
   0x7   : > { %p41_p0 = scmp.ne.s32.totalorder %s3869_s16, %s3865_s15  ;;  %p42_p1 = scmp.eq.s32.totalorder %s3935_s19, 0 }
   0x8   : > { %p128_p2 = scmp.eq.s32.totalorder %s3935_s19, 1  ;;  %p134_p3 = scmp.eq.s32.totalorder %s2817_s20, 1 }
   0x9   : > { %p3944_p4 = por %p42_p1, %p41_p0  ;;  %p2818_p5 = scmp.ge.s32.totalorder %s3877_s18, 1 }
   0xa   : > { %p3949_p6 = por %p134_p3, %p41_p0  ;;  %p141_p7 = scmp.lt.s32.totalorder %s3877_s18, 3 }
   0xb   : > { %s152_s25 = sshll.u32 %s4552_s1, 4  ;;  %s3879_s27 = smov [#allocation7]   ;;  %s153_s25 = int_to_ptr.hbm [resolvable:$true] %s152_s25 }
   0xc   : > { %p3957_p8 = pnand %p2818_p5, %p141_p7  ;;  %s154_s28 = sshll.u32 %s3879_s27, 4  ;;  %s155_s28 = int_to_ptr.vmem [resolvable:$true] %s154_s28 }
   0xd   : > { %s166_s5 = sshll.u32 %s4553_s2, 4  ;;  %s3880_s6 = smov 384   ;;  %s167_s5 = int_to_ptr.hbm [resolvable:$true] %s166_s5 }
   0xe   : > { %p3525_p9 = pneg %p3957_p8  ;;  %s3881_s7 = smov 24  }
   0xf   : > { %s3882_s8 = smov [#allocation9]   ;;  %s3883_s10 = smov 64  }
  0x10   : > { %p3526_p10 = pnand %p3525_p9, %p42_p1  ;;  %s168_s9 = sshll.u32 %s3882_s8, 4  ;;  %s169_s9 = int_to_ptr.vmem [resolvable:$true] %s168_s9 }
  0x11   : > { %s3884_s11 = smov 4   ;;  %s3970_s12 = sadd.s32 1, %s3877_s18  }
  0x12   : > { %3528 = dma.hbm_to_vmem [thread:$0]  (!%p3526_p10), %s153_s25, 6144, %s155_s28, [#allocation8], %s3880_s6, %s3880_s6, %s3881_s7  }
  0x13   : > { %3531 = dma.hbm_to_vmem [thread:$0]  (!%p3526_p10), %s167_s5, 2048, %s169_s9, [#allocation8], %s3883_s10, %s3883_s10, %s3884_s11  }
  0x14   : > { %s25_s13 = ssub.s32 %s3877_s18, %s3970_s12  ;;  %s28_s14 = sadd.s32 1, %s3873_s17 }
  0x15   : > { %p26_p12 = scmp.eq.s32.totalorder %s25_s13, 0  ;;  %p35_p13 = scmp.ne.s32.totalorder %s3873_s17, %s3869_s16 }
  0x16   : > { %p36_p0 = scmp.eq.s32.totalorder %s3877_s18, 0  ;;  %p3542_p7 = scmp.lt.s32.totalorder %s3877_s18, 2 }
  0x17   : > { %s3979_s20 = scalar_select %p26_p12, %s3873_s17, %s28_s14  }
  0x18   : > { %p37_p3 = por %p36_p0, %p35_p13  ;;  %p3983_p5 = por %p128_p2, %p35_p13 }
  0x19   : > { %s185_s24 = sand.u32 1, %s3873_s17   ;;  %s3366_s27 = sshll.u32 %s3877_s18, 7 }
  0x1a   : > { %s2822_s25 = sshll.u32 %s185_s24, 7  ;;  %s195_s30 = scalar_lea.hbm %s4551_s0, %s3366_s27 }
  0x1b   : > { %s189_s5 = scalar_lea.vmem [#allocation4], %s2822_s25  ;;  %s196_s7 = sshll.u32 %s195_s30, 4  ;;  %s197_s7 = int_to_ptr.hbm [resolvable:$true] %s196_s7 }
  0x1c   : > { %s198_s6 = sshll.u32 %s189_s5, 4  ;;  %p3993_p9 = pnand %p3542_p7, %p37_p3  ;;  %s199_s6 = int_to_ptr.vmem [resolvable:$true] %s198_s6 }
  0x1d   : > { %s186_s9 = scalar_lea.sflag [#allocation5], %s185_s24  ;;  %s3777_s10 = sshra.s32 %s197_s7, 4  ;;  %s3778_s10 = int_to_ptr.hbm [resolvable:$true] %s3777_s10 }
  0x1e   : > { %s3779_s11 = scalar_lea.hbm %s3778_s10, 128  ;;  %p3781_p10 = pneg %p3993_p9 }
  0x1f   : > { %p3780_p2 = scmp.ne.s32.totalorder %s3778_s10, %s3779_s11  ;;  %s3784_s25 = scalar_lea.hbm %s4551_s0, 256 }
  0x20   : > { %p3785_p0 = scmp.lt.s32.totalorder %s3778_s10, %s4551_s0  ;;  %p3786_p3 = scmp.lt.s32.totalorder %s3784_s25, %s3779_s11 }
  0x21   : > { %p3782_p12 = pnand %p3781_p10, %p3780_p2 }
  0x22   : > { %p3787_p7 = por %p3786_p3, %p3785_p0 }
  0x23   : > { %p3783_p13 = pneg %p3782_p12 }
  0x25   : > { %p3788_p11 = pnand %p3787_p7, %p3783_p13 }
  0x27   : > { %3791 = shalt.err (!%p3788_p11)
}
  0x28   : > { %s3885_s24 = smov 128   ;;  %s3886_s29 = smov 8  }
  0x29   : > { %3535 = dma.hbm_to_vmem [thread:$0]  (!%p3993_p9), %s197_s7, 2048, %s199_s6, %s186_s9, %s3885_s24, %s3885_s24, %s3886_s29  }
  0x2a   : > { %210 = sbr.rel (%p3957_p8) target bundleno = 1343 (0x53f), region = 36  ;;  %s4010_s30 = sand.u32 (!%p3957_p8), 1, %s3869_s16  }
  0x2b   : > { %s2827_s5 = sshll.u32 (!%p3957_p8), %s4010_s30, 7  ;;  %s213_s10 = scalar_lea.sflag (!%p3957_p8), [#allocation5], %s4010_s30 }
  0x2c   : > { %s4016_s11 = scalar_lea.vmem (!%p3957_p8), [#allocation4], %s2827_s5 }
  0x2f   : > { %3852 = dma.done.wait (%p3944_p4), %s213_s10, 2048  }
  0x30   : > { %3854 = vsyncadd (%p3944_p4), %s213_s10, 4294965248 }
  0x31   : > { %3856 = dma.done.wait (%p42_p1), [#allocation8], 8192  }
  0x32   : > { %3858 = vsyncadd (%p42_p1), [#allocation8], 4294959104  ;;  %v3001_v0 = vld [vmem:[#allocation7 + $0x150] sm:$0xf]  ;;  %v3412_v1 = vld [vmem:[#allocation7 + $0x164] sm:$0xf0] }
  0x33   : > { %v3409_v2 = vld [vmem:[#allocation7 + $0x154] sm:$0xf]  ;;  %v3002_v3 = vor.u32 %v3412_v1, %v3001_v0  ;;  %v3003_v4 = vld [vmem:[#allocation7 + $0x168] sm:$0xf0]  ;;  %v2977_v5 = vld [vmem:[#allocation7 + $0x120] sm:$0xf] }
  0x34   : > { %v3406_v6 = vld [vmem:[#allocation7 + $0x134] sm:$0xf0]  ;;  %v3006_v7 = vor.u32 %v3409_v2, %v3003_v4  ;;  %v3403_v8 = vld [vmem:[#allocation7 + $0x124] sm:$0xf]  ;;  %v2979_v9 = vld [vmem:[#allocation7 + $0x138] sm:$0xf0] }
  0x35   : > { %3497 = vmatpush.bf16.msra.mxu2 %v3002_v3  ;;  %v2978_v10 = vor.u32 %v3406_v6, %v2977_v5  ;;  %567 = vmatpush.bf16.msra.mxu0 %v3002_v3  ;;  %v2982_v11 = vor.u32 %v3403_v8, %v2979_v9  ;;  %v2953_v12 = vld [vmem:[#allocation7 + $0xf0] sm:$0xf]  ;;  %v3400_v13 = vld [vmem:[#allocation7 + $0x104] sm:$0xf0]  ;;  %v3397_v14 = vld [vmem:[#allocation7 + $0xf4] sm:$0xf] }
  0x36   : > { %3505 = vmatpush.bf16.msra.mxu3 %v3006_v7  ;;  %616 = vmatpush.bf16.msra.mxu1 %v3006_v7  ;;  %v2955_v15 = vld [vmem:[#allocation7 + $0x108] sm:$0xf0]  ;;  %v2954_v16 = vor.u32 %v3400_v13, %v2953_v12  ;;  %v2929_v18 = vld [vmem:[#allocation7 + $0xc0] sm:$0xf]  ;;  %v3394_v19 = vld [vmem:[#allocation7 + $0xd4] sm:$0xf0] }
  0x37   : > { %v2958_v17 = vor.u32 %v3397_v14, %v2955_v15  ;;  %v3391_v20 = vld [vmem:[#allocation7 + $0xc4] sm:$0xf]  ;;  %v2931_v21 = vld [vmem:[#allocation7 + $0xd8] sm:$0xf0]  ;;  %v2930_v22 = vor.u32 %v3394_v19, %v2929_v18  ;;  %v2905_v24 = vld [vmem:[#allocation7 + $0x90] sm:$0xf] }
  0x38   : > { %v2934_v23 = vor.u32 %v3391_v20, %v2931_v21  ;;  %v3388_v25 = vld [vmem:[#allocation7 + $0xa4] sm:$0xf0]  ;;  %v3385_v26 = vld [vmem:[#allocation7 + $0x94] sm:$0xf]  ;;  %v2907_v27 = vld [vmem:[#allocation7 + $0xa8] sm:$0xf0] }
  0x39   : > { %3498 = vmatpush.bf16.msra.mxu2 %v2978_v10  ;;  %568 = vmatpush.bf16.msra.mxu0 %v2978_v10  ;;  %v2906_v28 = vor.u32 %v3388_v25, %v2905_v24  ;;  %v2910_v29 = vor.u32 %v3385_v26, %v2907_v27  ;;  %v2881_v30 = vld [vmem:[#allocation7 + $0x60] sm:$0xf]  ;;  %v3382_v31 = vld [vmem:[#allocation7 + $0x74] sm:$0xf0]  ;;  %v3379_v32 = vld [vmem:[#allocation7 + $0x64] sm:$0xf] }
  0x3a   : > { %3506 = vmatpush.bf16.msra.mxu3 %v2982_v11  ;;  %617 = vmatpush.bf16.msra.mxu1 %v2982_v11  ;;  %v2883_v33 = vld [vmem:[#allocation7 + $0x78] sm:$0xf0]  ;;  %v2882_v34 = vor.u32 %v3382_v31, %v2881_v30  ;;  %v2857_v36 = vld [vmem:[#allocation7 + $0x30] sm:$0xf]  ;;  %v3376_v37 = vld [vmem:[#allocation7 + $0x44] sm:$0xf0] }
  0x3b   : > { %v2886_v35 = vor.u32 %v3379_v32, %v2883_v33  ;;  %v3373_v38 = vld [vmem:[#allocation7 + $0x34] sm:$0xf]  ;;  %v2859_v39 = vld [vmem:[#allocation7 + $0x48] sm:$0xf0]  ;;  %v2858_v40 = vor.u32 %v3376_v37, %v2857_v36  ;;  %v2833_v42 = vld [vmem:[#allocation7] sm:$0xf] }
  0x3c   : > { %v2862_v41 = vor.u32 %v3373_v38, %v2859_v39  ;;  %v3370_v43 = vld [vmem:[#allocation7 + $0x14] sm:$0xf0]  ;;  %v3367_v44 = vld [vmem:[#allocation7 + $0x4] sm:$0xf]  ;;  %v2835_v45 = vld [vmem:[#allocation7 + $0x18] sm:$0xf0] }
  0x3d   : > { %3499 = vmatpush.bf16.msra.mxu2 %v2954_v16  ;;  %569 = vmatpush.bf16.msra.mxu0 %v2954_v16  ;;  %v2834_v46 = vor.u32 %v3370_v43, %v2833_v42  ;;  %v263_v47 = vld [vmem:[%s4016_s11 + $0x40] sm:$0xff]  ;;  %v264_v48 = vld [vmem:[%s4016_s11 + $0x48] sm:$0xff]  ;;  %v2838_v49 = vor.u32 %v3367_v44, %v2835_v45  ;;  %v3009_v51 = vld [vmem:[#allocation7 + $0x158] sm:$0xf]  ;;  %vm1213_vm0 = vcmask 130048   ;;  %s4484_s6 = scalar_lea.vmem [#allocation10], %s2827_s5 }
  0x3e   : > { %3507 = vmatpush.bf16.msra.mxu3 %v2958_v17  ;;  %618 = vmatpush.bf16.msra.mxu1 %v2958_v17  ;;  %v4028_v50 = vpack.c.bf16 %v264_v48, %v263_v47  ;;  %v3413_v52 = vld [vmem:[#allocation7 + $0x16c] sm:$0xf0]  ;;  %v3410_v53 = vld [vmem:[#allocation7 + $0x15c] sm:$0xf]  ;;  %v3011_v55 = vld [vmem:[#allocation7 + $0x170] sm:$0xf0] }
  0x3f   : > { %v3010_v54 = vor.u32 %v3413_v52, %v3009_v51  ;;  %v3014_v56 = vor.u32 %v3410_v53, %v3011_v55  ;;  %v2985_v57 = vld [vmem:[#allocation7 + $0x128] sm:$0xf]  ;;  %v3407_v58 = vld [vmem:[#allocation7 + $0x13c] sm:$0xf0]  ;;  %v3404_v59 = vld [vmem:[#allocation7 + $0x12c] sm:$0xf] }
  0x40   : > { %v2986_v60 = vor.u32 %v3407_v58, %v2985_v57  ;;  %v2987_v61 = vld [vmem:[#allocation7 + $0x140] sm:$0xf0]  ;;  %v2961_v63 = vld [vmem:[#allocation7 + $0xf8] sm:$0xf]  ;;  %v3401_v0 = vld [vmem:[#allocation7 + $0x10c] sm:$0xf0] }
  0x41   : > { %3500 = vmatpush.bf16.msra.mxu2 %v2930_v22  ;;  %570 = vmatpush.bf16.msra.mxu0 %v2930_v22  ;;  %v2990_v62 = vor.u32 %v3404_v59, %v2987_v61  ;;  %v3398_v1 = vld [vmem:[#allocation7 + $0xfc] sm:$0xf]  ;;  %v2963_v2 = vld [vmem:[#allocation7 + $0x110] sm:$0xf0]  ;;  %v2962_v3 = vor.u32 %v3401_v0, %v2961_v63  ;;  %v2937_v5 = vld [vmem:[#allocation7 + $0xc8] sm:$0xf] }
  0x42   : > { %3508 = vmatpush.bf16.msra.mxu3 %v2934_v23  ;;  %619 = vmatpush.bf16.msra.mxu1 %v2934_v23  ;;  %v2966_v4 = vor.u32 %v3398_v1, %v2963_v2  ;;  %v3395_v6 = vld [vmem:[#allocation7 + $0xdc] sm:$0xf0]  ;;  %v3392_v7 = vld [vmem:[#allocation7 + $0xcc] sm:$0xf]  ;;  %v2939_v8 = vld [vmem:[#allocation7 + $0xe0] sm:$0xf0] }
  0x43   : > { %v265_v9 = vld [vmem:[%s4016_s11 + $0x50] sm:$0xff]  ;;  %v266_v10 = vld [vmem:[%s4016_s11 + $0x58] sm:$0xff]  ;;  %v2938_v11 = vor.u32 %v3395_v6, %v2937_v5  ;;  %v2942_v12 = vor.u32 %v3392_v7, %v2939_v8  ;;  %v255_v14 = vld [vmem:[%s4016_s11] sm:$0xff]  ;;  %s3496_s7 = sshll.u32 %s3935_s19, 7  ;;  %s2722_s14 = sshll.u32 %s4484_s6, 4  ;;  %s2723_s14 = int_to_ptr.vmem [resolvable:$true] %s2722_s14 }
  0x44   : > { %v4034_v13 = vpack.c.bf16 %v266_v10, %v265_v9  ;;  %v256_v15 = vld [vmem:[%s4016_s11 + $0x8] sm:$0xff]  ;;  %v2913_v17 = vld [vmem:[#allocation7 + $0x98] sm:$0xf]  ;;  %v3389_v18 = vld [vmem:[#allocation7 + $0xac] sm:$0xf0]  ;;  %s2721_s13 = scalar_lea.hbm %s4555_s4, %s3496_s7  ;;  %s2709_s27 = scalar_lea.sflag [#allocation6], %s4010_s30 }
  0x45   : > { %3501 = vmatpush.bf16.msra.mxu2 %v2906_v28  ;;  %571 = vmatpush.bf16.msra.mxu0 %v2906_v28  ;;  %v4038_v16 = vpack.c.bf16 %v256_v15, %v255_v14  ;;  %v3386_v19 = vld [vmem:[#allocation7 + $0x9c] sm:$0xf]  ;;  %v2914_v20 = vor.u32 %v3389_v18, %v2913_v17  ;;  %v2915_v21 = vld [vmem:[#allocation7 + $0xb0] sm:$0xf0]  ;;  %v2889_v23 = vld [vmem:[#allocation7 + $0x68] sm:$0xf] }
  0x46   : > { %3509 = vmatpush.bf16.msra.mxu3 %v2910_v29  ;;  %620 = vmatpush.bf16.msra.mxu1 %v2910_v29  ;;  %v2918_v22 = vor.u32 %v3386_v19, %v2915_v21  ;;  %v3383_v24 = vld [vmem:[#allocation7 + $0x7c] sm:$0xf0]  ;;  %v3380_v25 = vld [vmem:[#allocation7 + $0x6c] sm:$0xf]  ;;  %v2891_v27 = vld [vmem:[#allocation7 + $0x80] sm:$0xf0] }
  0x47   : > { %v2890_v26 = vor.u32 %v3383_v24, %v2889_v23  ;;  %v2894_v28 = vor.u32 %v3380_v25, %v2891_v27  ;;  %v2865_v29 = vld [vmem:[#allocation7 + $0x38] sm:$0xf]  ;;  %v3377_v30 = vld [vmem:[#allocation7 + $0x4c] sm:$0xf0]  ;;  %v3374_v31 = vld [vmem:[#allocation7 + $0x3c] sm:$0xf] }
  0x48   : > { %v2867_v32 = vld [vmem:[#allocation7 + $0x50] sm:$0xf0]  ;;  %v2866_v33 = vor.u32 %v3377_v30, %v2865_v29  ;;  %v3371_v36 = vld [vmem:[#allocation7 + $0x1c] sm:$0xf0]  ;;  %v3368_v37 = vld [vmem:[#allocation7 + $0xc] sm:$0xf] }
  0x49   : > { %3502 = vmatpush.bf16.msra.mxu2 %v2882_v34  ;;  %572 = vmatpush.bf16.msra.mxu0 %v2882_v34  ;;  %v2870_v34 = vor.u32 %v3374_v31, %v2867_v32  ;;  %v2843_v38 = vld [vmem:[#allocation7 + $0x20] sm:$0xf0]  ;;  %v257_v44 = vld [vmem:[%s4016_s11 + $0x10] sm:$0xff]  ;;  %v258_v45 = vld [vmem:[%s4016_s11 + $0x18] sm:$0xff]  ;;  %s2724_s25 = sshll.u32 %s2721_s13, 4  ;;  %s3827_s5 = scalar_lea.hbm %s4555_s4, 256  ;;  %s2725_s25 = int_to_ptr.hbm [resolvable:$true] %s2724_s25 }
  0x4a   : > { %3510 = vmatpush.bf16.msra.mxu3 %v2886_v35  ;;  %621 = vmatpush.bf16.msra.mxu1 %v2886_v35  ;;  %v2841_v35 = vld [vmem:[#allocation7 + $0x8] sm:$0xf]  ;;  %v267_v39 = vld [vmem:[%s4016_s11 + $0x60] sm:$0xff]  ;;  %v2846_v42 = vor.u32 %v3368_v37, %v2843_v38  ;;  %v269_v47 = vld [vmem:[%s4016_s11 + $0x70] sm:$0xff]  ;;  %s3821_s19 = sshra.s32 %s2725_s25, 4  ;;  %s3822_s19 = int_to_ptr.hbm [resolvable:$true] %s3821_s19 }
  0x4b   : > { %v270_v48 = vld [vmem:[%s4016_s11 + $0x78] sm:$0xff]  ;;  %v259_v51 = vld [vmem:[%s4016_s11 + $0x20] sm:$0xff]  ;;  %v260_v52 = vld [vmem:[%s4016_s11 + $0x28] sm:$0xff]  ;;  %s3823_s28 = scalar_lea.hbm %s3822_s19, 128  ;;  %p3828_p11 = scmp.lt.s32.totalorder %s3822_s19, %s4555_s4 }
  0x4c   : > { %v4062_v53 = vpack.c.bf16 %v260_v52, %v259_v51  ;;  %v3414_v55 = vld [vmem:[#allocation7 + $0x174] sm:$0xf0]  ;;  %v2993_v57 = vld [vmem:[#allocation7 + $0x130] sm:$0xf]  ;;  %v3408_v58 = vld [vmem:[#allocation7 + $0x144] sm:$0xf0]  ;;  %p3824_p1 = scmp.ne.s32.totalorder %s3822_s19, %s3823_s28  ;;  %p3829_p9 = scmp.lt.s32.totalorder %s3827_s5, %s3823_s28 }
  0x4d   : > { %3503 = vmatpush.bf16.msra.mxu2 %v2858_v40  ;;  %573 = vmatpush.bf16.msra.mxu0 %v2858_v40  ;;  %v268_v40 = vld [vmem:[%s4016_s11 + $0x68] sm:$0xff]  ;;  %v2994_v59 = vor.u32 %v3408_v58, %v2993_v57  ;;  %v3402_v61 = vld [vmem:[#allocation7 + $0x114] sm:$0xf0]  ;;  %v2945_v63 = vld [vmem:[#allocation7 + $0xd0] sm:$0xf] }
  0x4e   : > { %3511 = vmatpush.bf16.msra.mxu3 %v2862_v41  ;;  %622 = vmatpush.bf16.msra.mxu1 %v2862_v41  ;;  %v2842_v41 = vor.u32 %v3371_v36, %v2841_v35  ;;  %v4046_v43 = vpack.c.bf16 %v268_v40, %v267_v39  ;;  %v3396_v0 = vld [vmem:[#allocation7 + $0xe4] sm:$0xf0]  ;;  %v261_v2 = vld [vmem:[%s4016_s11 + $0x30] sm:$0xff]  ;;  %v2921_v5 = vld [vmem:[#allocation7 + $0xa0] sm:$0xf]  ;;  %p3825_p4 = pnand %p3824_p1, %p3983_p5  ;;  %p3830_p2 = por %p3829_p9, %p3828_p11 }
  0x4f   : > { %v2946_v1 = vor.u32 %v3396_v0, %v2945_v63  ;;  %v3390_v6 = vld [vmem:[#allocation7 + $0xb4] sm:$0xf0]  ;;  %v3411_v7 = vld [vmem:[#allocation7 + $0x164] sm:$0xf]  ;;  %v3019_v9 = vld [vmem:[#allocation7 + $0x178] sm:$0xf0] }
  0x50   : > { %v2922_v8 = vor.u32 %v3390_v6, %v2921_v5  ;;  %v3022_v10 = vor.u32 %v3411_v7, %v3019_v9  ;;  %v3405_v14 = vld [vmem:[#allocation7 + $0x134] sm:$0xf]  ;;  %v2995_v17 = vld [vmem:[#allocation7 + $0x148] sm:$0xf0]  ;;  %v2873_v19 = vld [vmem:[#allocation7 + $0x40] sm:$0xf]  ;;  %p3826_p8 = pneg %p3825_p4 }
  0x51   : > { %3504 = vmatpush.bf16.msra.mxu2 %v2834_v46  ;;  %574 = vmatpush.bf16.msra.mxu0 %v2834_v46  ;;  %v4050_v46 = vpack.c.bf16 %v258_v45, %v257_v44  ;;  %v2998_v18 = vor.u32 %v3405_v14, %v2995_v17  ;;  %v3399_v21 = vld [vmem:[#allocation7 + $0x104] sm:$0xf]  ;;  %v2971_v23 = vld [vmem:[#allocation7 + $0x118] sm:$0xf0]  ;;  %v2849_v25 = vld [vmem:[#allocation7 + $0x10] sm:$0xf] }
  0x52   : > { %3512 = vmatpush.bf16.msra.mxu3 %v2838_v49  ;;  %623 = vmatpush.bf16.msra.mxu1 %v2838_v49  ;;  %v4058_v49 = vpack.c.bf16 %v270_v48, %v269_v47  ;;  %v2974_v24 = vor.u32 %v3399_v21, %v2971_v23  ;;  %v3393_v27 = vld [vmem:[#allocation7 + $0xd4] sm:$0xf]  ;;  %v2947_v29 = vld [vmem:[#allocation7 + $0xe8] sm:$0xf0]  ;;  %v3387_v31 = vld [vmem:[#allocation7 + $0xa4] sm:$0xf]  ;;  %p3831_p10 = pnand %p3830_p2, %p3826_p8 }
  0x53   : > { %v2950_v30 = vor.u32 %v3393_v27, %v2947_v29  ;;  %v2923_v32 = vld [vmem:[#allocation7 + $0xb8] sm:$0xf0]  ;;  %v2899_v35 = vld [vmem:[#allocation7 + $0x88] sm:$0xf0]  ;;  %v3375_v37 = vld [vmem:[#allocation7 + $0x44] sm:$0xf] }
  0x54   : > { %595 = vmatmul.bf16.vlgmr.msra.gmra.mxu2 %v4028_v50  ;;  %575 = vmatmul.bf16.vlgmr.msra.gmra.mxu0 %v4038_v16  ;;  %v2875_v38 = vld [vmem:[#allocation7 + $0x58] sm:$0xf0]  ;;  %v3369_v40 = vld [vmem:[#allocation7 + $0x14] sm:$0xf] }
  0x55   : > { %644 = vmatmul.bf16.vlgmr.msra.gmra.mxu3 %v4028_v50  ;;  %665 = vmatpush.bf16.msrb.mxu2 %v3010_v54  ;;  %v3017_v54 = vld [vmem:[#allocation7 + $0x160] sm:$0xf]  ;;  %v2878_v39 = vor.u32 %v3375_v37, %v2875_v38 }
  0x56   : > { %714 = vmatpush.bf16.msrb.mxu3 %v3014_v56  ;;  %624 = vmatmul.bf16.vlgmr.msra.gmra.mxu1 %v4038_v16  ;;  %v3018_v56 = vor.u32 %v3414_v55, %v3017_v54 }
  0x57   : > { %812 = vmatpush.bf16.msrb.mxu1 %v3022_v10 }
  0x58   : > { %763 = vmatpush.bf16.msrb.mxu0 %v3018_v56 }
  0x59   : > { %666 = vmatpush.bf16.msrb.mxu2 %v2986_v60  ;;  %v2969_v60 = vld [vmem:[#allocation7 + $0x100] sm:$0xf] }
  0x5a   : > { %715 = vmatpush.bf16.msrb.mxu3 %v2990_v62  ;;  %v2970_v62 = vor.u32 %v3402_v61, %v2969_v60 }
  0x5b   : > { %813 = vmatpush.bf16.msrb.mxu1 %v2998_v18 }
  0x5c   : > { %764 = vmatpush.bf16.msrb.mxu0 %v2994_v59 }
  0x5d   : > { %667 = vmatpush.bf16.msrb.mxu2 %v2962_v3  ;;  %v262_v3 = vld [vmem:[%s4016_s11 + $0x38] sm:$0xff] }
  0x5e   : > { %716 = vmatpush.bf16.msrb.mxu3 %v2966_v4  ;;  %v4070_v4 = vpack.c.bf16 %v262_v3, %v261_v2 }
  0x5f   : > { %814 = vmatpush.bf16.msrb.mxu1 %v2974_v24 }
  0x60   : > { %765 = vmatpush.bf16.msrb.mxu0 %v2970_v62 }
  0x61   : > { %668 = vmatpush.bf16.msrb.mxu2 %v2938_v11  ;;  %v2897_v11 = vld [vmem:[#allocation7 + $0x70] sm:$0xf] }
  0x62   : > { %717 = vmatpush.bf16.msrb.mxu3 %v2942_v12  ;;  %v3384_v12 = vld [vmem:[#allocation7 + $0x84] sm:$0xf0] }
  0x63   : > { %v2898_v15 = vor.u32 %v3384_v12, %v2897_v11  ;;  %815 = vmatpush.bf16.msrb.mxu1 %v2950_v30 }
  0x64   : > { %600 = vmatmul.bf16.gmra.mxu2 %v4034_v13  ;;  %580 = vmatmul.bf16.gmra.mxu0 %v4050_v46 }
  0x65   : > { %649 = vmatmul.bf16.gmra.mxu3 %v4034_v13  ;;  %669 = vmatpush.bf16.msrb.mxu2 %v2914_v20  ;;  %v3378_v20 = vld [vmem:[#allocation7 + $0x54] sm:$0xf0] }
  0x66   : > { %718 = vmatpush.bf16.msrb.mxu3 %v2918_v22  ;;  %629 = vmatmul.bf16.gmra.mxu1 %v4050_v46  ;;  %v2874_v22 = vor.u32 %v3378_v20, %v2873_v19 }
  0x67   : > { %766 = vmatpush.bf16.msrb.mxu0 %v2946_v1 }
  0x69   : > { %670 = vmatpush.bf16.msrb.mxu2 %v2890_v26  ;;  %v3372_v26 = vld [vmem:[#allocation7 + $0x24] sm:$0xf0] }
  0x6a   : > { %719 = vmatpush.bf16.msrb.mxu3 %v2894_v28  ;;  %v2850_v28 = vor.u32 %v3372_v26, %v2849_v25 }
  0x6b   : > { %767 = vmatpush.bf16.msrb.mxu0 %v2922_v8 }
  0x6d   : > { %671 = vmatpush.bf16.msrb.mxu2 %v2866_v33  ;;  %v2926_v33 = vor.u32 %v3387_v31, %v2923_v32 }
  0x6e   : > { %720 = vmatpush.bf16.msrb.mxu3 %v2870_v34  ;;  %v3381_v34 = vld [vmem:[#allocation7 + $0x74] sm:$0xf] }
  0x6f   : > { %768 = vmatpush.bf16.msrb.mxu0 %v2898_v15  ;;  %816 = vmatpush.bf16.msrb.mxu1 %v2926_v33  ;;  %v2902_v36 = vor.u32 %v3381_v34, %v2899_v35 }
  0x71   : > { %672 = vmatpush.bf16.msrb.mxu2 %v2842_v41  ;;  %v2851_v41 = vld [vmem:[#allocation7 + $0x28] sm:$0xf0] }
  0x72   : > { %721 = vmatpush.bf16.msrb.mxu3 %v2846_v42  ;;  %v2854_v42 = vor.u32 %v3369_v40, %v2851_v41 }
  0x73   : > { %769 = vmatpush.bf16.msrb.mxu0 %v2874_v22  ;;  %817 = vmatpush.bf16.msrb.mxu1 %v2902_v36 }
  0x74   : > { %605 = vmatmul.bf16.gmra.mxu2 %v4046_v43  ;;  %585 = vmatmul.bf16.gmra.mxu0 %v4062_v53 }
  0x75   : > { %654 = vmatmul.bf16.gmra.mxu3 %v4046_v43 }
  0x76   : > { %634 = vmatmul.bf16.gmra.mxu1 %v4062_v53 }
  0x77   : > { %770 = vmatpush.bf16.msrb.mxu0 %v2850_v28  ;;  %818 = vmatpush.bf16.msrb.mxu1 %v2878_v39 }
  0x7b   : > { %819 = vmatpush.bf16.msrb.mxu1 %v2854_v42 }
  0x84   : > { %610 = vmatmul.bf16.gmra.mxu2 %v4058_v49  ;;  %590 = vmatmul.bf16.gmra.mxu0 %v4070_v4 }
  0x85   : > { %659 = vmatmul.bf16.gmra.mxu3 %v4058_v49 }
  0x86   : > { %639 = vmatmul.bf16.gmra.mxu1 %v4070_v4 }
  0x94   : > { %673 = vmatmul.bf16.vlgmr.msrb.gmra.mxu2 %v4038_v16  ;;  %771 = vmatmul.bf16.vlgmr.msrb.gmra.mxu0 %v4038_v16 }
  0x95   : > { %722 = vmatmul.bf16.vlgmr.msrb.gmra.mxu3 %v4038_v16 }
  0x96   : > { %820 = vmatmul.bf16.vlgmr.msrb.gmra.mxu1 %v4038_v16 }
  0xa4   : > { %678 = vmatmul.bf16.gmra.mxu2 %v4050_v46  ;;  %776 = vmatmul.bf16.gmra.mxu0 %v4050_v46 }
  0xa5   : > { %727 = vmatmul.bf16.gmra.mxu3 %v4050_v46 }
  0xa6   : > { %825 = vmatmul.bf16.gmra.mxu1 %v4050_v46 }
  0xb4   : > { %683 = vmatmul.bf16.gmra.mxu2 %v4062_v53  ;;  %781 = vmatmul.bf16.gmra.mxu0 %v4062_v53 }
  0xb5   : > { %732 = vmatmul.bf16.gmra.mxu3 %v4062_v53 }
  0xb6   : > { %830 = vmatmul.bf16.gmra.mxu1 %v4062_v53 }
  0xc4   : > { %688 = vmatmul.bf16.gmra.mxu2 %v4070_v4  ;;  %786 = vmatmul.bf16.gmra.mxu0 %v4070_v4 }
  0xc5   : > { %737 = vmatmul.bf16.gmra.mxu3 %v4070_v4 }
  0xc6   : > { %835 = vmatmul.bf16.gmra.mxu1 %v4070_v4 }
  0xd1   : > { %v576_v52 = vpop.f32.mrf.mxu0 }
  0xd3   : > { %v625_v59 = vpop.f32.mrf.mxu1 }
  0xd4   : > { %693 = vmatmul.bf16.gmra.mxu2 %v4028_v50  ;;  %791 = vmatmul.bf16.gmra.mxu0 %v4028_v50  ;;  %v861_v1 = vpack.c.bf16 %v625_v59, %v576_v52 }
  0xd5   : > { %742 = vmatmul.bf16.gmra.mxu3 %v4028_v50 }
  0xd6   : > { %840 = vmatmul.bf16.gmra.mxu1 %v4028_v50  ;;  %909 = vst [vmem:[#allocation2] sm:$0xff] %v861_v1 }
  0xd7   : > { %v596_v44 = vpop.f32.mrf.mxu2 }
  0xd8   : > { %v645_v45 = vpop.f32.mrf.mxu3 }
  0xd9   : > { %v885_v47 = vpack.c.bf16 %v645_v45, %v596_v44  ;;  %v578_v55 = vpop.f32.mrf.mxu0 }
  0xdb   : > { %933 = vst [vmem:[#allocation2 + $0xc0] sm:$0xff] %v885_v47  ;;  %v627_v0 = vpop.f32.mrf.mxu1 }
  0xdc   : > { %v864_v7 = vpack.c.bf16 %v627_v0, %v578_v55 }
  0xdd   : > { %v3025_v41 = vld [vmem:[#allocation2] sm:$0xf]  ;;  %v3129_v45 = vld [vmem:[#allocation2 + $0x4] sm:$0xf] }
  0xde   : > { %912 = vst [vmem:[#allocation2 + $0x18] sm:$0xff] %v864_v7 }
  0xdf   : > { %v598_v16 = vpop.f32.mrf.mxu2 }
  0xe0   : > { %v647_v48 = vpop.f32.mrf.mxu3 }
  0xe1   : > { %v888_v51 = vpack.c.bf16 %v647_v48, %v598_v16  ;;  %v581_v60 = vpop.f32.mrf.mxu0 }
  0xe3   : > { %936 = vst [vmem:[#allocation2 + $0xd8] sm:$0xff] %v888_v51  ;;  %v630_v6 = vpop.f32.mrf.mxu1 }
  0xe4   : > { %698 = vmatmul.bf16.gmra.mxu2 %v4034_v13  ;;  %796 = vmatmul.bf16.gmra.mxu0 %v4034_v13  ;;  %v867_v12 = vpack.c.bf16 %v630_v6, %v581_v60 }
  0xe5   : > { %747 = vmatmul.bf16.gmra.mxu3 %v4034_v13  ;;  %v3415_v42 = vld [vmem:[#allocation2 + $0x14] sm:$0xf0]  ;;  %v3439_v47 = vld [vmem:[#allocation2 + $0x18] sm:$0xf0] }
  0xe6   : > { %845 = vmatmul.bf16.gmra.mxu1 %v4034_v13  ;;  %915 = vst [vmem:[#allocation2 + $0x30] sm:$0xff] %v867_v12  ;;  %v3026_v51 = vor.u32 %v3415_v42, %v3025_v41  ;;  %v3130_v52 = vor.u32 %v3439_v47, %v3129_v45 }
  0xe7   : > { %v601_v46 = vpop.f32.mrf.mxu2 }
  0xe8   : > { %v650_v54 = vpop.f32.mrf.mxu3 }
  0xe9   : > { %v891_v53 = vpack.c.bf16 %v650_v54, %v601_v46  ;;  %v583_v2 = vpop.f32.mrf.mxu0 }
  0xeb   : > { %939 = vst [vmem:[#allocation2 + $0xf0] sm:$0xff] %v891_v53  ;;  %v632_v11 = vpop.f32.mrf.mxu1 }
  0xec   : > { %v870_v20 = vpack.c.bf16 %v632_v11, %v583_v2 }
  0xed   : > { %v3033_v2 = vld [vmem:[#allocation2 + $0x30] sm:$0xf] }
  0xee   : > { %918 = vst [vmem:[#allocation2 + $0x48] sm:$0xff] %v870_v20 }
  0xef   : > { %v603_v56 = vpop.f32.mrf.mxu2 }
  0xf0   : > { %v652_v57 = vpop.f32.mrf.mxu3 }
  0xf1   : > { %v894_v58 = vpack.c.bf16 %v652_v57, %v603_v56  ;;  %v586_v8 = vpop.f32.mrf.mxu0 }
  0xf3   : > { %942 = vst [vmem:[#allocation2 + $0x108] sm:$0xff] %v894_v58  ;;  %v635_v18 = vpop.f32.mrf.mxu1 }
  0xf4   : > { %703 = vmatmul.bf16.gmra.mxu2 %v4046_v43  ;;  %801 = vmatmul.bf16.gmra.mxu0 %v4046_v43  ;;  %v873_v25 = vpack.c.bf16 %v635_v18, %v586_v8 }
  0xf5   : > { %752 = vmatmul.bf16.gmra.mxu3 %v4046_v43 }
  0xf6   : > { %850 = vmatmul.bf16.gmra.mxu1 %v4046_v43  ;;  %921 = vst [vmem:[#allocation2 + $0x60] sm:$0xff] %v873_v25 }
  0xf7   : > { %v606_v61 = vpop.f32.mrf.mxu2 }
  0xf8   : > { %v655_v62 = vpop.f32.mrf.mxu3 }
  0xf9   : > { %v897_v63 = vpack.c.bf16 %v655_v62, %v606_v61  ;;  %v588_v19 = vpop.f32.mrf.mxu0 }
  0xfb   : > { %945 = vst [vmem:[#allocation2 + $0x120] sm:$0xff] %v897_v63  ;;  %v637_v23 = vpop.f32.mrf.mxu1 }
  0xfc   : > { %v876_v30 = vpack.c.bf16 %v637_v23, %v588_v19 }
  0xfd   : > { %v3041_v20 = vld [vmem:[#allocation2 + $0x60] sm:$0xf] }
  0xfe   : > { %924 = vst [vmem:[#allocation2 + $0x78] sm:$0xff] %v876_v30 }
  0xff   : > { %v608_v3 = vpop.f32.mrf.mxu2 }
 0x100   : > { %v657_v4 = vpop.f32.mrf.mxu3 }
 0x101   : > { %v900_v5 = vpack.c.bf16 %v657_v4, %v608_v3  ;;  %v591_v24 = vpop.f32.mrf.mxu0  ;;  %v3416_v3 = vld [vmem:[#allocation2 + $0x44] sm:$0xf0]  ;;  %v3137_v4 = vld [vmem:[#allocation2 + $0x34] sm:$0xf] }
 0x103   : > { %948 = vst [vmem:[#allocation2 + $0x138] sm:$0xff] %v900_v5  ;;  %v640_v29 = vpop.f32.mrf.mxu1  ;;  %v3440_v5 = vld [vmem:[#allocation2 + $0x48] sm:$0xf0] }
 0x104   : > { %708 = vmatmul.bf16.gmra.mxu2 %v4058_v49  ;;  %806 = vmatmul.bf16.gmra.mxu0 %v4058_v49  ;;  %v879_v44 = vpack.c.bf16 %v640_v29, %v591_v24  ;;  %v3138_v8 = vor.u32 %v3440_v5, %v3137_v4 }
 0x105   : > { %757 = vmatmul.bf16.gmra.mxu3 %v4058_v49 }
 0x106   : > { %855 = vmatmul.bf16.gmra.mxu1 %v4058_v49  ;;  %927 = vst [vmem:[#allocation2 + $0x90] sm:$0xff] %v879_v44 }
 0x107   : > { %v611_v50 = vpop.f32.mrf.mxu2 }
 0x108   : > { %v660_v9 = vpop.f32.mrf.mxu3 }
 0x109   : > { %v903_v10 = vpack.c.bf16 %v660_v9, %v611_v50  ;;  %v593_v31 = vpop.f32.mrf.mxu0  ;;  %v3034_v50 = vor.u32 %v3416_v3, %v3033_v2 }
 0x10b   : > { %951 = vst [vmem:[#allocation2 + $0x150] sm:$0xff] %v903_v10  ;;  %v642_v35 = vpop.f32.mrf.mxu1 }
 0x10c   : > { %v882_v53 = vpack.c.bf16 %v642_v35, %v593_v31 }
 0x10e   : > { %930 = vst [vmem:[#allocation2 + $0xa8] sm:$0xff] %v882_v53 }
 0x10f   : > { %v613_v14 = vpop.f32.mrf.mxu2 }
 0x110   : > { %v662_v15 = vpop.f32.mrf.mxu3 }
 0x111   : > { %v906_v17 = vpack.c.bf16 %v662_v15, %v613_v14  ;;  %v772_v49 = vpop.f32.mrf.mxu0 }
 0x113   : > { %954 = vst [vmem:[#allocation2 + $0x168] sm:$0xff] %v906_v17  ;;  %v821_v54 = vpop.f32.mrf.mxu1 }
 0x117   : > { %v674_v13 = vpop.f32.mrf.mxu2 }
 0x118   : > { %v723_v21 = vpop.f32.mrf.mxu3 }
 0x119   : > { %v862_v22 = vpack.c.bf16 %v723_v21, %v674_v13  ;;  %v774_v59 = vpop.f32.mrf.mxu0  ;;  %v3417_v13 = vld [vmem:[#allocation2 + $0x74] sm:$0xf0] }
 0x11a   : > { %v3042_v25 = vor.u32 %v3417_v13, %v3041_v20  ;;  %v3444_v20 = vld [vmem:[#allocation2 + $0x108] sm:$0xf0] }
 0x11b   : > { %910 = vst [vmem:[#allocation2 + $0x8] sm:$0xff] %v862_v22  ;;  %v823_v1 = vpop.f32.mrf.mxu1 }
 0x11c   : > { %v866_v35 = vpack.c.bf16 %v823_v1, %v774_v59  ;;  %v3419_v59 = vld [vmem:[#allocation2 + $0xd4] sm:$0xf0] }
 0x11e   : > { %914 = vst [vmem:[#allocation2 + $0x28] sm:$0xff] %v866_v35 }
 0x11f   : > { %v676_v26 = vpop.f32.mrf.mxu2 }
 0x120   : > { %v725_v27 = vpop.f32.mrf.mxu3 }
 0x121   : > { %v865_v28 = vpack.c.bf16 %v725_v27, %v676_v26  ;;  %v777_v10 = vpop.f32.mrf.mxu0  ;;  %v863_v27 = vpack.c.bf16 %v821_v54, %v772_v49 }
 0x122   : > { %v3029_v34 = vld [vmem:[#allocation2 + $0x8] sm:$0xf]  ;;  %v3133_v37 = vld [vmem:[#allocation2 + $0xc] sm:$0xf] }
 0x123   : > { %913 = vst [vmem:[#allocation2 + $0x20] sm:$0xff] %v865_v28  ;;  %v826_v11 = vpop.f32.mrf.mxu1 }
 0x124   : > { %911 = vst [vmem:[#allocation2 + $0x10] sm:$0xff] %v863_v27  ;;  %v869_v45 = vpack.c.bf16 %v826_v11, %v777_v10 }
 0x126   : > { %917 = vst [vmem:[#allocation2 + $0x40] sm:$0xff] %v869_v45 }
 0x127   : > { %v679_v32 = vpop.f32.mrf.mxu2 }
 0x128   : > { %v728_v43 = vpop.f32.mrf.mxu3 }
 0x129   : > { %v868_v33 = vpack.c.bf16 %v728_v43, %v679_v32  ;;  %v779_v21 = vpop.f32.mrf.mxu0 }
 0x12a   : > { %v3423_v36 = vld [vmem:[#allocation2 + $0x1c] sm:$0xf0]  ;;  %v3447_v38 = vld [vmem:[#allocation2 + $0x20] sm:$0xf0] }
 0x12b   : > { %916 = vst [vmem:[#allocation2 + $0x38] sm:$0xff] %v868_v33  ;;  %v3030_v39 = vor.u32 %v3423_v36, %v3029_v34  ;;  %v3134_v40 = vor.u32 %v3447_v38, %v3133_v37  ;;  %v828_v22 = vpop.f32.mrf.mxu1  ;;  %v3049_v36 = vld [vmem:[#allocation2 + $0x90] sm:$0xf]  ;;  %v3418_v37 = vld [vmem:[#allocation2 + $0xa4] sm:$0xf0] }
 0x12d   : > { %1024 = vmatpush.bf16.xpose.msra.mxu2 %v3030_v39  ;;  %1729 = vmatpush.bf16.xpose.msra.mxu0 %v3134_v40  ;;  %v3050_v40 = vor.u32 %v3418_v37, %v3049_v36 }
 0x12f   : > { %v681_v16 = vpop.f32.mrf.mxu2 }
 0x130   : > { %v730_v48 = vpop.f32.mrf.mxu3 }
 0x131   : > { %v871_v46 = vpack.c.bf16 %v730_v48, %v681_v16  ;;  %v782_v29 = vpop.f32.mrf.mxu0 }
 0x132   : > { %v3037_v58 = vld [vmem:[#allocation2 + $0x38] sm:$0xf]  ;;  %v3141_v61 = vld [vmem:[#allocation2 + $0x3c] sm:$0xf] }
 0x133   : > { %919 = vst [vmem:[#allocation2 + $0x50] sm:$0xff] %v871_v46  ;;  %v831_v31 = vpop.f32.mrf.mxu1 }
 0x134   : > { %1025 = vmatmul.bf16.vlgmr.msra.gmra.mxu2 %v3026_v51  ;;  %1730 = vmatmul.bf16.vlgmr.msra.gmra.mxu0 %v3130_v52  ;;  %v875_v3 = vpack.c.bf16 %v831_v31, %v782_v29 }
 0x136   : > { %923 = vst [vmem:[#allocation2 + $0x70] sm:$0xff] %v875_v3 }
 0x137   : > { %v684_v55 = vpop.f32.mrf.mxu2 }
 0x138   : > { %v733_v56 = vpop.f32.mrf.mxu3 }
 0x139   : > { %v874_v57 = vpack.c.bf16 %v733_v56, %v684_v55  ;;  %v784_v42 = vpop.f32.mrf.mxu0  ;;  %v872_v55 = vpack.c.bf16 %v828_v22, %v779_v21 }
 0x13a   : > { %v3424_v60 = vld [vmem:[#allocation2 + $0x4c] sm:$0xf0]  ;;  %v3448_v62 = vld [vmem:[#allocation2 + $0x50] sm:$0xf0] }
 0x13b   : > { %922 = vst [vmem:[#allocation2 + $0x68] sm:$0xff] %v874_v57  ;;  %v3038_v63 = vor.u32 %v3424_v60, %v3037_v58  ;;  %v3142_v0 = vor.u32 %v3448_v62, %v3141_v61  ;;  %v833_v44 = vpop.f32.mrf.mxu1  ;;  %v3443_v60 = vld [vmem:[#allocation2 + $0xd8] sm:$0xf0] }
 0x13c   : > { %920 = vst [vmem:[#allocation2 + $0x58] sm:$0xff] %v872_v55  ;;  %v878_v4 = vpack.c.bf16 %v833_v44, %v784_v42 }
 0x13d   : > { %1050 = vmatpush.bf16.xpose.msra.mxu3 %v3038_v63  ;;  %1755 = vmatpush.bf16.xpose.msra.mxu1 %v3142_v0  ;;  %v3057_v63 = vld [vmem:[#allocation2 + $0xc0] sm:$0xf]  ;;  %v3161_v0 = vld [vmem:[#allocation2 + $0xc4] sm:$0xf] }
 0x13e   : > { %v3058_v1 = vor.u32 %v3419_v59, %v3057_v63  ;;  %v3162_v2 = vor.u32 %v3443_v60, %v3161_v0  ;;  %926 = vst [vmem:[#allocation2 + $0x88] sm:$0xff] %v878_v4 }
 0x13f   : > { %v686_v6 = vpop.f32.mrf.mxu2 }
 0x140   : > { %v735_v7 = vpop.f32.mrf.mxu3 }
 0x141   : > { %v877_v9 = vpack.c.bf16 %v735_v7, %v686_v6  ;;  %v787_v56 = vpop.f32.mrf.mxu0 }
 0x142   : > { %v3045_v17 = vld [vmem:[#allocation2 + $0x68] sm:$0xf] }
 0x143   : > { %925 = vst [vmem:[#allocation2 + $0x80] sm:$0xff] %v877_v9  ;;  %v836_v57 = vpop.f32.mrf.mxu1 }
 0x144   : > { %1051 = vmatmul.bf16.vlgmr.msra.gmra.mxu3 %v3034_v50  ;;  %1756 = vmatmul.bf16.vlgmr.msra.gmra.mxu1 %v3138_v8 }
 0x147   : > { %v689_v12 = vpop.f32.mrf.mxu2 }
 0x148   : > { %v738_v14 = vpop.f32.mrf.mxu3 }
 0x149   : > { %v880_v15 = vpack.c.bf16 %v738_v14, %v689_v12  ;;  %v789_v5 = vpop.f32.mrf.mxu0 }
 0x14a   : > { %v3425_v18 = vld [vmem:[#allocation2 + $0x7c] sm:$0xf0] }
 0x14b   : > { %928 = vst [vmem:[#allocation2 + $0x98] sm:$0xff] %v880_v15  ;;  %v3046_v19 = vor.u32 %v3425_v18, %v3045_v17  ;;  %v838_v6 = vpop.f32.mrf.mxu1  ;;  %v881_v17 = vpack.c.bf16 %v836_v57, %v787_v56 }
 0x14d   : > { %1076 = vmatpush.bf16.xpose.msrb.mxu2 %v3046_v19  ;;  %v3420_v19 = vld [vmem:[#allocation2 + $0x104] sm:$0xf0]  ;;  %929 = vst [vmem:[#allocation2 + $0xa0] sm:$0xff] %v881_v17 }
 0x14f   : > { %v691_v23 = vpop.f32.mrf.mxu2 }
 0x150   : > { %v740_v24 = vpop.f32.mrf.mxu3 }
 0x151   : > { %v883_v26 = vpack.c.bf16 %v740_v24, %v691_v23  ;;  %v792_v13 = vpop.f32.mrf.mxu0  ;;  %v3065_v24 = vld [vmem:[#allocation2 + $0xf0] sm:$0xf] }
 0x152   : > { %v3053_v43 = vld [vmem:[#allocation2 + $0x98] sm:$0xf] }
 0x153   : > { %931 = vst [vmem:[#allocation2 + $0xb0] sm:$0xff] %v883_v26  ;;  %v841_v22 = vpop.f32.mrf.mxu1  ;;  %v3066_v26 = vor.u32 %v3420_v19, %v3065_v24 }
 0x154   : > { %1077 = vmatmul.bf16.vlgmr.msrb.gmra.mxu2 %v3042_v25  ;;  %v3169_v25 = vld [vmem:[#allocation2 + $0xf4] sm:$0xf]  ;;  %v887_v29 = vpack.c.bf16 %v841_v22, %v792_v13 }
 0x155   : > { %v3170_v27 = vor.u32 %v3444_v20, %v3169_v25 }
 0x156   : > { %935 = vst [vmem:[#allocation2 + $0xd0] sm:$0xff] %v887_v29 }
 0x157   : > { %v694_v28 = vpop.f32.mrf.mxu2 }
 0x158   : > { %v743_v30 = vpop.f32.mrf.mxu3 }
 0x159   : > { %v886_v32 = vpack.c.bf16 %v743_v30, %v694_v28  ;;  %v884_v28 = vpack.c.bf16 %v838_v6, %v789_v5 }
 0x15a   : > { %v3426_v33 = vld [vmem:[#allocation2 + $0xac] sm:$0xf0] }
 0x15b   : > { %934 = vst [vmem:[#allocation2 + $0xc8] sm:$0xff] %v886_v32  ;;  %v3054_v34 = vor.u32 %v3426_v33, %v3053_v43  ;;  %v843_v35 = vpop.f32.mrf.mxu1 }
 0x15c   : > { %932 = vst [vmem:[#allocation2 + $0xb8] sm:$0xff] %v884_v28 }
 0x15d   : > { %1102 = vmatpush.bf16.xpose.msrb.mxu3 %v3054_v34  ;;  %v794_v34 = vpop.f32.mrf.mxu0 }
 0x15f   : > { %v696_v38 = vpop.f32.mrf.mxu2 }
 0x160   : > { %v745_v39 = vpop.f32.mrf.mxu3 }
 0x161   : > { %v889_v41 = vpack.c.bf16 %v745_v39, %v696_v38  ;;  %v3421_v38 = vld [vmem:[#allocation2 + $0x134] sm:$0xf0] }
 0x162   : > { %v3061_v48 = vld [vmem:[#allocation2 + $0xc8] sm:$0xf]  ;;  %v3165_v52 = vld [vmem:[#allocation2 + $0xcc] sm:$0xf] }
 0x163   : > { %937 = vst [vmem:[#allocation2 + $0xe0] sm:$0xff] %v889_v41  ;;  %v3073_v41 = vld [vmem:[#allocation2 + $0x120] sm:$0xf]  ;;  %v846_v45 = vpop.f32.mrf.mxu1 }
 0x164   : > { %1103 = vmatmul.bf16.vlgmr.msrb.gmra.mxu3 %v3050_v40  ;;  %v3074_v42 = vor.u32 %v3421_v38, %v3073_v41 }
 0x165   : > { %v797_v44 = vpop.f32.mrf.mxu0 }
 0x167   : > { %v699_v47 = vpop.f32.mrf.mxu2 }
 0x168   : > { %v748_v16 = vpop.f32.mrf.mxu3 }
 0x169   : > { %v892_v49 = vpack.c.bf16 %v748_v16, %v699_v47  ;;  %v890_v47 = vpack.c.bf16 %v843_v35, %v794_v34  ;;  %v3455_v34 = vld [vmem:[#allocation2 + $0x28] sm:$0xf0] }
 0x16a   : > { %v3427_v51 = vld [vmem:[#allocation2 + $0xdc] sm:$0xf0]  ;;  %v3451_v46 = vld [vmem:[#allocation2 + $0xe0] sm:$0xf0] }
 0x16b   : > { %940 = vst [vmem:[#allocation2 + $0xf8] sm:$0xff] %v892_v49  ;;  %v3062_v54 = vor.u32 %v3427_v51, %v3061_v48  ;;  %v3166_v53 = vor.u32 %v3451_v46, %v3165_v52  ;;  %v848_v52 = vpop.f32.mrf.mxu1  ;;  %v3422_v46 = vld [vmem:[#allocation2 + $0x164] sm:$0xf0] }
 0x16c   : > { %938 = vst [vmem:[#allocation2 + $0xe8] sm:$0xff] %v890_v47  ;;  %v3198_v47 = vld [vmem:[#allocation2 + $0x44] sm:$0xf] }
 0x16d   : > { %1128 = vmatpush.bf16.xpose.msra.mxu2 %v3062_v54  ;;  %1833 = vmatpush.bf16.xpose.msrb.mxu0 %v3166_v53  ;;  %v799_v51 = vpop.f32.mrf.mxu0  ;;  %v893_v54 = vpack.c.bf16 %v846_v45, %v797_v44  ;;  %v3081_v53 = vld [vmem:[#allocation2 + $0x150] sm:$0xf]  ;;  %v3094_v44 = vld [vmem:[#allocation2 + $0x40] sm:$0xf]  ;;  %v3432_v45 = vld [vmem:[#allocation2 + $0x54] sm:$0xf0] }
 0x16e   : > { %v3082_v55 = vor.u32 %v3422_v46, %v3081_v53  ;;  %v896_v56 = vpack.c.bf16 %v848_v52, %v799_v51 }
 0x16f   : > { %v701_v58 = vpop.f32.mrf.mxu2  ;;  %941 = vst [vmem:[#allocation2 + $0x100] sm:$0xff] %v893_v54 }
 0x170   : > { %v750_v61 = vpop.f32.mrf.mxu3  ;;  %944 = vst [vmem:[#allocation2 + $0x118] sm:$0xff] %v896_v56 }
 0x171   : > { %v895_v62 = vpack.c.bf16 %v750_v61, %v701_v58 }
 0x172   : > { %v3069_v9 = vld [vmem:[#allocation2 + $0xf8] sm:$0xf]  ;;  %v3173_v11 = vld [vmem:[#allocation2 + $0xfc] sm:$0xf] }
 0x173   : > { %943 = vst [vmem:[#allocation2 + $0x110] sm:$0xff] %v895_v62  ;;  %v851_v58 = vpop.f32.mrf.mxu1 }
 0x174   : > { %1129 = vmatmul.bf16.vlgmr.msra.gmra.mxu2 %v3058_v1  ;;  %1834 = vmatmul.bf16.vlgmr.msrb.gmra.mxu0 %v3162_v2 }
 0x175   : > { %v802_v57 = vpop.f32.mrf.mxu0 }
 0x176   : > { %v899_v59 = vpack.c.bf16 %v851_v58, %v802_v57 }
 0x177   : > { %v704_v7 = vpop.f32.mrf.mxu2 }
 0x178   : > { %v753_v50 = vpop.f32.mrf.mxu3  ;;  %947 = vst [vmem:[#allocation2 + $0x130] sm:$0xff] %v899_v59 }
 0x179   : > { %v898_v8 = vpack.c.bf16 %v753_v50, %v704_v7 }
 0x17a   : > { %v3428_v10 = vld [vmem:[#allocation2 + $0x10c] sm:$0xf0]  ;;  %v3452_v12 = vld [vmem:[#allocation2 + $0x110] sm:$0xf0] }
 0x17b   : > { %946 = vst [vmem:[#allocation2 + $0x128] sm:$0xff] %v898_v8  ;;  %v3070_v14 = vor.u32 %v3428_v10, %v3069_v9  ;;  %v3174_v15 = vor.u32 %v3452_v12, %v3173_v11  ;;  %v853_v61 = vpop.f32.mrf.mxu1 }
 0x17d   : > { %1154 = vmatpush.bf16.xpose.msra.mxu3 %v3070_v14  ;;  %1859 = vmatpush.bf16.xpose.msrb.mxu1 %v3174_v15  ;;  %v804_v60 = vpop.f32.mrf.mxu0 }
 0x17e   : > { %v902_v63 = vpack.c.bf16 %v853_v61, %v804_v60 }
 0x17f   : > { %v706_v18 = vpop.f32.mrf.mxu2 }
 0x180   : > { %v755_v21 = vpop.f32.mrf.mxu3  ;;  %950 = vst [vmem:[#allocation2 + $0x148] sm:$0xff] %v902_v63  ;;  %v3099_v63 = vld [vmem:[#allocation2 + $0x70] sm:$0xf] }
 0x181   : > { %v901_v23 = vpack.c.bf16 %v755_v21, %v706_v18 }
 0x182   : > { %v3077_v43 = vld [vmem:[#allocation2 + $0x128] sm:$0xf] }
 0x183   : > { %949 = vst [vmem:[#allocation2 + $0x140] sm:$0xff] %v901_v23  ;;  %v856_v2 = vpop.f32.mrf.mxu1 }
 0x184   : > { %1155 = vmatmul.bf16.vlgmr.msra.gmra.mxu3 %v3066_v26  ;;  %1860 = vmatmul.bf16.vlgmr.msrb.gmra.mxu1 %v3170_v27 }
 0x185   : > { %v807_v1 = vpop.f32.mrf.mxu0 }
 0x186   : > { %v905_v4 = vpack.c.bf16 %v856_v2, %v807_v1 }
 0x187   : > { %v709_v30 = vpop.f32.mrf.mxu2 }
 0x188   : > { %v758_v31 = vpop.f32.mrf.mxu3  ;;  %953 = vst [vmem:[#allocation2 + $0x160] sm:$0xff] %v905_v4 }
 0x189   : > { %v904_v32 = vpack.c.bf16 %v758_v31, %v709_v30  ;;  %v3089_v31 = vld [vmem:[#allocation2 + $0x10] sm:$0xf] }
 0x18a   : > { %v3429_v33 = vld [vmem:[#allocation2 + $0x13c] sm:$0xf0] }
 0x18b   : > { %952 = vst [vmem:[#allocation2 + $0x158] sm:$0xff] %v904_v32  ;;  %v3078_v36 = vor.u32 %v3429_v33, %v3077_v43  ;;  %v858_v7 = vpop.f32.mrf.mxu1  ;;  %v3431_v32 = vld [vmem:[#allocation2 + $0x24] sm:$0xf0]  ;;  %v3193_v43 = vld [vmem:[#allocation2 + $0x14] sm:$0xf] }
 0x18c   : > { %v3090_v33 = vor.u32 %v3431_v32, %v3089_v31  ;;  %v3194_v35 = vor.u32 %v3455_v34, %v3193_v43 }
 0x18d   : > { %1180 = vmatpush.bf16.xpose.msrb.mxu2 %v3078_v36  ;;  %v809_v6 = vpop.f32.mrf.mxu0 }
 0x18e   : > { %v908_v8 = vpack.c.bf16 %v858_v7, %v809_v6  ;;  %2115 = vmatpush.bf16.msra.mxu0 %v3194_v35 }
 0x18f   : > { %v711_v37 = vpop.f32.mrf.mxu2 }
 0x190   : > { %v760_v39 = vpop.f32.mrf.mxu3  ;;  %956 = vst [vmem:[#allocation2 + $0x178] sm:$0xff] %v908_v8 }
 0x191   : > { %v907_v40 = vpack.c.bf16 %v760_v39, %v711_v37 }
 0x192   : > { %v3085_v16 = vld [vmem:[#allocation2 + $0x158] sm:$0xf] }
 0x193   : > { %955 = vst [vmem:[#allocation2 + $0x170] sm:$0xff] %v907_v40 }
 0x194   : > { %1181 = vmatmul.bf16.vlgmr.msrb.gmra.mxu2 %v3074_v42 }
 0x195   : > { %1411 = vmatpush.bf16.msra.mxu2 %v3090_v33 }
 0x19a   : > { %v3430_v49 = vld [vmem:[#allocation2 + $0x16c] sm:$0xf0] }
 0x19b   : > { %v3086_v48 = vor.u32 %v3430_v49, %v3085_v16  ;;  %v3095_v16 = vor.u32 %v3432_v45, %v3094_v44  ;;  %v3456_v49 = vld [vmem:[#allocation2 + $0x58] sm:$0xf0]  ;;  %v3435_v44 = vld [vmem:[#allocation2 + $0xe4] sm:$0xf0] }
 0x19d   : > { %1206 = vmatpush.bf16.xpose.msrb.mxu3 %v3086_v48  ;;  %v3199_v48 = vor.u32 %v3456_v49, %v3198_v47  ;;  %v3213_v47 = vld [vmem:[#allocation2 + $0xd4] sm:$0xf] }
 0x19f   : > { %2143 = vmatpush.bf16.msra.mxu1 %v3199_v48 }
 0x1a4   : > { %1207 = vmatmul.bf16.vlgmr.msrb.gmra.mxu3 %v3082_v55 }
 0x1a5   : > { %1439 = vmatpush.bf16.msra.mxu3 %v3095_v16  ;;  %v3459_v16 = vld [vmem:[#allocation2 + $0xe8] sm:$0xf0] }
 0x1a6   : > { %v3214_v48 = vor.u32 %v3459_v16, %v3213_v47  ;;  %v3449_v47 = vld [vmem:[#allocation2 + $0x80] sm:$0xf0] }
 0x1a8   : > { %2227 = vmatpush.bf16.msrb.mxu0 %v3214_v48 }
 0x1b1   : > { %v4164_v39 = vpop.f32.mrf.mxu0 }
 0x1b2   : > { %v1918_v42 = vsel %vm1213_vm0, %v4164_v39, -inf }
 0x1b7   : > { %v4106_v62 = vpop.f32.mrf.mxu2 }
 0x1b8   : > { %v1214_v0 = vsel %vm1213_vm0, %v4106_v62, -inf }
 0x1b9   : > { %1215 = vmax.xlane.f32.xlu0 %v1214_v0  ;;  %v4175_v54 = vpop.f32.mrf.mxu0  ;;  %v3433_v0 = vld [vmem:[#allocation2 + $0x84] sm:$0xf0] }
 0x1ba   : > { %v1921_v58 = vsel %vm1213_vm0, %v4175_v54, -inf  ;;  %v3100_v1 = vor.u32 %v3433_v0, %v3099_v63 }
 0x1bc   : > { %1467 = vmatpush.bf16.msrb.mxu2 %v3100_v1 }
 0x1bf   : > { %v4110_v3 = vpop.f32.mrf.mxu2 }
 0x1c0   : > { %v1217_v5 = vsel %vm1213_vm0, %v4110_v3, -inf }
 0x1c1   : > { %1218 = vmax.xlane.f32.xlu0 %v1217_v5  ;;  %v4162_v38 = vpop.f32.mrf.mxu1 }
 0x1c7   : > { %v4114_v50 = vpop.f32.mrf.mxu3 }
 0x1c8   : > { %v1220_v9 = vsel %vm1213_vm0, %v4114_v50, -inf }
 0x1c9   : > { %1221 = vmax.xlane.f32.xlu1 %v1220_v9  ;;  %v4172_v52 = vpop.f32.mrf.mxu1 }
 0x1ca   : > { %v1927_v56 = vsel %vm1213_vm0, %v4172_v52, -inf }
 0x1cf   : > { %v4118_v10 = vpop.f32.mrf.mxu3 }
 0x1d0   : > { %v1223_v11 = vsel %vm1213_vm0, %v4118_v10, -inf }
 0x1d1   : > { %1224 = vmax.xlane.f32.xlu1 %v1223_v11 }
 0x1d7   : > { %v4122_v12 = vpop.f32.mrf.mxu2 }
 0x1d8   : > { %v1226_v14 = vsel %vm1213_vm0, %v4122_v12, -inf }
 0x1d9   : > { %1227 = vmax.xlane.f32.xlu2 %v1226_v14 }
 0x1df   : > { %v4126_v15 = vpop.f32.mrf.mxu2 }
 0x1e0   : > { %v1229_v17 = vsel %vm1213_vm0, %v4126_v15, -inf }
 0x1e1   : > { %1230 = vmax.xlane.f32.xlu2 %v1229_v17 }
 0x1e7   : > { %v4130_v18 = vpop.f32.mrf.mxu3 }
 0x1e8   : > { %v1232_v19 = vsel %vm1213_vm0, %v4130_v18, -inf }
 0x1e9   : > { %1233 = vmax.xlane.f32.xlu0 %v1232_v19 }
 0x1ef   : > { %v4134_v20 = vpop.f32.mrf.mxu3 }
 0x1f0   : > { %v1235_v13 = vsel %vm1213_vm0, %v4134_v20, -inf }
 0x1f1   : > { %1236 = vmax.xlane.f32.xlu1 %v1235_v13 }
 0x1f7   : > { %v4138_v21 = vpop.f32.mrf.mxu2 }
 0x1f8   : > { %v1238_v22 = vsel %vm1213_vm0, %v4138_v21, -inf }
 0x1f9   : > { %1239 = vmax.xlane.f32.xlu2 %v1238_v22  ;;  %v3434_v22 = vld [vmem:[#allocation2 + $0xb4] sm:$0xf0] }
 0x1ff   : > { %v4142_v23 = vpop.f32.mrf.mxu2 }
 0x200   : > { %v1241_v24 = vsel %vm1213_vm0, %v4142_v23, -inf }
 0x201   : > { %1242 = vmax.xlane.f32.xlu0 %v1241_v24 }
 0x207   : > { %v4146_v25 = vpop.f32.mrf.mxu3 }
 0x208   : > { %v1244_v26 = vsel %vm1213_vm0, %v4146_v25, -inf }
 0x209   : > { %1245 = vmax.xlane.f32.xlu1 %v1244_v26 }
 0x20f   : > { %v4150_v27 = vpop.f32.mrf.mxu3 }
 0x210   : > { %v1247_v28 = vsel %vm1213_vm0, %v4150_v27, -inf }
 0x211   : > { %1248 = vmax.xlane.f32.xlu2 %v1247_v28 }
 0x217   : > { %v4154_v29 = vpop.f32.mrf.mxu2 }
 0x218   : > { %v1250_v30 = vsel %vm1213_vm0, %v4154_v29, -inf }
 0x219   : > { %1251 = vmax.xlane.f32.xlu0 %v1250_v30 }
 0x21f   : > { %v4158_v36 = vpop.f32.mrf.mxu2 }
 0x220   : > { %v1253_v37 = vsel %vm1213_vm0, %v4158_v36, -inf }
 0x221   : > { %1254 = vmax.xlane.f32.xlu1 %v1253_v37 }
 0x227   : > { %v4166_v40 = vpop.f32.mrf.mxu3 }
 0x228   : > { %v1256_v41 = vsel %vm1213_vm0, %v4166_v40, -inf }
 0x229   : > { %1257 = vmax.xlane.f32.xlu2 %v1256_v41  ;;  %1919 = vmax.xlane.f32.xlu1 %v1918_v42 }
 0x22c   : > { %v1216_v51 = vpop.xlane.xlu0 %1215 }
 0x22d   : > { %v1262_v46 = vsub.f32 %v4106_v62, %v1216_v51  ;;  %v1924_v62 = vsel %vm1213_vm0, %v4162_v38, -inf }
 0x22f   : > { %v4177_v53 = vpop.f32.mrf.mxu3  ;;  %v1278_v57 = vmul.f32 1.442695, %v1262_v46 }
 0x230   : > { %v1259_v55 = vsel %vm1213_vm0, %v4177_v53, -inf }
 0x231   : > { %1260 = vmax.xlane.f32.xlu0 %v1259_v55  ;;  %1928 = vmax.xlane.f32.xlu1 %v1927_v56  ;;  %3589 = vpow2.f32 %v1278_v57 }
 0x232   : > { %1922 = vmax.xlane.f32.xlu2 %v1921_v58 }
 0x234   : > { %v1219_v59 = vpop.xlane.xlu0 %1218 }
 0x235   : > { %v1263_v60 = vsub.f32 %v4110_v3, %v1219_v59 }
 0x237   : > { %v1280_v61 = vmul.f32 1.442695, %v1263_v60  ;;  %v4188_v2 = vpop.eup %3589  ;;  %v3119_v60 = vld [vmem:[#allocation2 + $0x130] sm:$0xf] }
 0x238   : > { %v1374_v6 = vpack.c.bf16 %v4188_v2, %v4188_v2 }
 0x239   : > { %3591 = vpow2.f32 %v1280_v61  ;;  %1925 = vmax.xlane.f32.xlu0 %v1924_v62  ;;  %v3437_v61 = vld [vmem:[#allocation2 + $0x144] sm:$0xf0] }
 0x23a   : > { %v1392_v9 = vunpack.c.l.b16 %v1374_v6  ;;  %v3120_v0 = vor.u32 %v3437_v61, %v3119_v60 }
 0x23c   : > { %v1222_v4 = vpop.xlane.xlu1 %1221 }
 0x23d   : > { %v1264_v5 = vsub.f32 %v4114_v50, %v1222_v4  ;;  %v3104_v50 = vld [vmem:[#allocation2 + $0xa0] sm:$0xf] }
 0x23e   : > { %v3105_v24 = vor.u32 %v3434_v22, %v3104_v50  ;;  %v3114_v4 = vld [vmem:[#allocation2 + $0x100] sm:$0xf] }
 0x23f   : > { %v4193_v7 = vpop.eup %3591  ;;  %v1282_v8 = vmul.f32 1.442695, %v1264_v5  ;;  %v3436_v5 = vld [vmem:[#allocation2 + $0x114] sm:$0xf0] }
 0x240   : > { %v1375_v3 = vpack.c.bf16 %v4193_v7, %v4193_v7  ;;  %1495 = vmatpush.bf16.msrb.mxu3 %v3105_v24  ;;  %v3115_v6 = vor.u32 %v3436_v5, %v3114_v4  ;;  %v3157_v4 = vld [vmem:[#allocation2 + $0x9c] sm:$0xf] }
 0x241   : > { %3593 = vpow2.f32 %v1282_v8  ;;  %v3460_v8 = vld [vmem:[#allocation2 + $0x118] sm:$0xf0] }
 0x242   : > { %v1393_v11 = vunpack.c.l.b16 %v1375_v3  ;;  %v3218_v3 = vld [vmem:[#allocation2 + $0x104] sm:$0xf] }
 0x244   : > { %v1394_v14 = vpack.c.b16 %v1393_v11, %v1392_v9  ;;  %v1225_v17 = vpop.xlane.xlu1 %1224  ;;  %v3219_v11 = vor.u32 %v3460_v8, %v3218_v3 }
 0x245   : > { %v1265_v19 = vsub.f32 %v4118_v10, %v1225_v17 }
 0x246   : > { %3091 = vmatmul.msk.bf16.vlgmr.msra.gmra.mxu2 %vm1213_vm0, %v1394_v14  ;;  %2255 = vmatpush.bf16.msrb.mxu1 %v3219_v11 }
 0x247   : > { %v1284_v13 = vmul.f32 1.442695, %v1265_v19  ;;  %v4199_v26 = vpop.eup %3593 }
 0x248   : > { %v1376_v31 = vpack.c.bf16 %v4199_v26, %v4199_v26 }
 0x249   : > { %3595 = vpow2.f32 %v1284_v13 }
 0x24a   : > { %v1420_v33 = vunpack.c.l.b16 %v1376_v31 }
 0x24c   : > { %v1228_v28 = vpop.xlane.xlu2 %1227 }
 0x24d   : > { %v1266_v30 = vsub.f32 %v4122_v12, %v1228_v28  ;;  %v3109_v12 = vld [vmem:[#allocation2 + $0xd0] sm:$0xf]  ;;  %v3124_v28 = vld [vmem:[#allocation2 + $0x160] sm:$0xf] }
 0x24e   : > { %v3110_v45 = vor.u32 %v3435_v44, %v3109_v12 }
 0x24f   : > { %v4204_v32 = vpop.eup %3595  ;;  %v1286_v43 = vmul.f32 1.442695, %v1266_v30  ;;  %v3438_v30 = vld [vmem:[#allocation2 + $0x174] sm:$0xf0] }
 0x250   : > { %v1377_v10 = vpack.c.bf16 %v4204_v32, %v4204_v32  ;;  %1523 = vmatpush.bf16.msra.mxu2 %v3110_v45 }
 0x251   : > { %3597 = vpow2.f32 %v1286_v43  ;;  %v3125_v43 = vor.u32 %v3438_v30, %v3124_v28  ;;  %v3453_v28 = vld [vmem:[#allocation2 + $0x140] sm:$0xf0] }
 0x252   : > { %v1421_v34 = vunpack.c.l.b16 %v1377_v10 }
 0x254   : > { %v1422_v35 = vpack.c.b16 %v1421_v34, %v1420_v33  ;;  %v1231_v37 = vpop.xlane.xlu2 %1230 }
 0x255   : > { %v1267_v41 = vsub.f32 %v4126_v15, %v1231_v37 }
 0x256   : > { %3096 = vmatmul.msk.bf16.vlgmr.msra.gmra.mxu3 %vm1213_vm0, %v1422_v35 }
 0x257   : > { %v1288_v42 = vmul.f32 1.442695, %v1267_v41  ;;  %v4210_v49 = vpop.eup %3597  ;;  %1551 = vmatpush.bf16.msra.mxu3 %v3115_v6 }
 0x258   : > { %v1378_v15 = vpack.c.bf16 %v4210_v49, %v4210_v49 }
 0x259   : > { %3599 = vpow2.f32 %v1288_v42 }
 0x25a   : > { %v1448_v58 = vunpack.c.l.b16 %v1378_v15 }
 0x25c   : > { %v1234_v51 = vpop.xlane.xlu0 %1233 }
 0x25d   : > { %v1268_v46 = vsub.f32 %v4130_v18, %v1234_v51  ;;  %v3149_v51 = vld [vmem:[#allocation2 + $0x6c] sm:$0xf] }
 0x25e   : > { %v3150_v15 = vor.u32 %v3449_v47, %v3149_v51 }
 0x25f   : > { %v4215_v55 = vpop.eup %3599  ;;  %v1290_v57 = vmul.f32 1.442695, %v1268_v46 }
 0x260   : > { %v1379_v56 = vpack.c.bf16 %v4215_v55, %v4215_v55 }
 0x261   : > { %3601 = vpow2.f32 %v1290_v57 }
 0x262   : > { %v1449_v59 = vunpack.c.l.b16 %v1379_v56 }
 0x264   : > { %v1450_v62 = vpack.c.b16 %v1449_v59, %v1448_v58  ;;  %v1237_v63 = vpop.xlane.xlu1 %1236 }
 0x265   : > { %v1269_v18 = vsub.f32 %v4134_v20, %v1237_v63 }
 0x266   : > { %3101 = vmatmul.msk.bf16.vlgmr.msrb.gmra.mxu2 %vm1213_vm0, %v1450_v62 }
 0x267   : > { %v1292_v1 = vmul.f32 1.442695, %v1269_v18  ;;  %1579 = vmatpush.bf16.msrb.mxu2 %v3120_v0  ;;  %v4221_v9 = vpop.eup %3601  ;;  %v3450_v0 = vld [vmem:[#allocation2 + $0xb0] sm:$0xf0] }
 0x268   : > { %v1380_v20 = vpack.c.bf16 %v4221_v9, %v4221_v9  ;;  %v3158_v6 = vor.u32 %v3450_v0, %v3157_v4  ;;  %v3189_v4 = vld [vmem:[#allocation2 + $0x15c] sm:$0xf] }
 0x269   : > { %3603 = vpow2.f32 %v1292_v1 }
 0x26a   : > { %v1476_v22 = vunpack.c.l.b16 %v1380_v20 }
 0x26c   : > { %v1240_v14 = vpop.xlane.xlu2 %1239 }
 0x26d   : > { %v1270_v17 = vsub.f32 %v4138_v21, %v1240_v14 }
 0x26f   : > { %v4226_v19 = vpop.eup %3603  ;;  %v1294_v50 = vmul.f32 1.442695, %v1270_v17 }
 0x270   : > { %v1381_v13 = vpack.c.bf16 %v4226_v19, %v4226_v19 }
 0x271   : > { %3605 = vpow2.f32 %v1294_v50 }
 0x272   : > { %v1477_v24 = vunpack.c.l.b16 %v1381_v13 }
 0x274   : > { %v1478_v31 = vpack.c.b16 %v1477_v24, %v1476_v22  ;;  %v1243_v10 = vpop.xlane.xlu0 %1242 }
 0x275   : > { %v1271_v21 = vsub.f32 %v4142_v23, %v1243_v10 }
 0x276   : > { %3106 = vmatmul.msk.bf16.vlgmr.msrb.gmra.mxu3 %vm1213_vm0, %v1478_v31 }
 0x277   : > { %v1296_v33 = vmul.f32 1.442695, %v1271_v21  ;;  %1607 = vmatpush.bf16.msrb.mxu3 %v3125_v43  ;;  %v4232_v34 = vpop.eup %3605  ;;  %v3181_v21 = vld [vmem:[#allocation2 + $0x12c] sm:$0xf] }
 0x278   : > { %v1382_v41 = vpack.c.bf16 %v4232_v34, %v4232_v34 }
 0x279   : > { %3607 = vpow2.f32 %v1296_v33 }
 0x27a   : > { %v1504_v23 = vunpack.c.l.b16 %v1382_v41 }
 0x27c   : > { %v1246_v35 = vpop.xlane.xlu1 %1245 }
 0x27d   : > { %v1272_v37 = vsub.f32 %v4146_v25, %v1246_v35 }
 0x27f   : > { %v4237_v42 = vpop.eup %3607  ;;  %v1298_v44 = vmul.f32 1.442695, %v1272_v37  ;;  %v3182_v37 = vor.u32 %v3453_v28, %v3181_v21  ;;  %v3208_v28 = vld [vmem:[#allocation2 + $0xa4] sm:$0xf] }
 0x280   : > { %v1383_v12 = vpack.c.bf16 %v4237_v42, %v4237_v42 }
 0x281   : > { %3609 = vpow2.f32 %v1298_v44 }
 0x282   : > { %v1505_v45 = vunpack.c.l.b16 %v1383_v12 }
 0x284   : > { %v1506_v16 = vpack.c.b16 %v1505_v45, %v1504_v23  ;;  %v1249_v48 = vpop.xlane.xlu2 %1248 }
 0x285   : > { %v1273_v46 = vsub.f32 %v4150_v27, %v1249_v48 }
 0x286   : > { %3111 = vmatmul.msk.bf16.vlgmr.msra.gmra.mxu2 %vm1213_vm0, %v1506_v16 }
 0x287   : > { %v1300_v25 = vmul.f32 1.442695, %v1273_v46  ;;  %1781 = vmatpush.bf16.xpose.msra.mxu2 %v3150_v15  ;;  %v4243_v56 = vpop.eup %3609  ;;  %v3145_v15 = vld [vmem:[#allocation2 + $0x64] sm:$0xf] }
 0x288   : > { %v1384_v59 = vpack.c.bf16 %v4243_v56, %v4243_v56 }
 0x289   : > { %3611 = vpow2.f32 %v1300_v25  ;;  %v3441_v25 = vld [vmem:[#allocation2 + $0x78] sm:$0xf0] }
 0x28a   : > { %v1532_v62 = vunpack.c.l.b16 %v1384_v59  ;;  %v3454_v59 = vld [vmem:[#allocation2 + $0x170] sm:$0xf0] }
 0x28c   : > { %v1252_v57 = vpop.xlane.xlu0 %1251 }
 0x28d   : > { %v1274_v58 = vsub.f32 %v4154_v29, %v1252_v57 }
 0x28f   : > { %v4248_v60 = vpop.eup %3611  ;;  %v1302_v27 = vmul.f32 1.442695, %v1274_v58 }
 0x290   : > { %v1385_v61 = vpack.c.bf16 %v4248_v60, %v4248_v60 }
 0x291   : > { %3613 = vpow2.f32 %v1302_v27  ;;  %v3457_v27 = vld [vmem:[#allocation2 + $0x88] sm:$0xf0] }
 0x292   : > { %v1533_v63 = vunpack.c.l.b16 %v1385_v61  ;;  %v3203_v61 = vld [vmem:[#allocation2 + $0x74] sm:$0xf] }
 0x294   : > { %v1534_v18 = vpack.c.b16 %v1533_v63, %v1532_v62  ;;  %v1255_v1 = vpop.xlane.xlu1 %1254 }
 0x295   : > { %v1275_v5 = vsub.f32 %v4158_v36, %v1255_v1  ;;  %v3146_v1 = vor.u32 %v3441_v25, %v3145_v15 }
 0x296   : > { %3116 = vmatmul.msk.bf16.vlgmr.msra.gmra.mxu3 %vm1213_vm0, %v1534_v18 }
 0x297   : > { %v1304_v29 = vmul.f32 1.442695, %v1275_v5  ;;  %1807 = vmatpush.bf16.xpose.msra.mxu3 %v3158_v6  ;;  %v4254_v3 = vpop.eup %3613  ;;  %v3190_v5 = vor.u32 %v3454_v59, %v3189_v4  ;;  %v3204_v6 = vor.u32 %v3457_v27, %v3203_v61 }
 0x298   : > { %v1386_v17 = vpack.c.bf16 %v4254_v3, %v4254_v3 }
 0x299   : > { %3615 = vpow2.f32 %v1304_v29 }
 0x29a   : > { %v1560_v22 = vunpack.c.l.b16 %v1386_v17 }
 0x29c   : > { %v1258_v8 = vpop.xlane.xlu2 %1257  ;;  %v1920_v11 = vpop.xlane.xlu1 %1919 }
 0x29d   : > { %v1276_v14 = vsub.f32 %v4166_v40, %v1258_v8  ;;  %v1966_v13 = vsub.f32 %v4164_v39, %v1920_v11 }
 0x29f   : > { %v4259_v20 = vpop.eup %3615  ;;  %v1306_v50 = vmul.f32 1.442695, %v1276_v14  ;;  %v1982_v30 = vmul.f32 1.442695, %v1966_v13 }
 0x2a0   : > { %v1387_v36 = vpack.c.bf16 %v4259_v20, %v4259_v20 }
 0x2a1   : > { %3617 = vpow2.f32 %v1306_v50  ;;  %v3445_v50 = vld [vmem:[#allocation2 + $0x138] sm:$0xf0] }
 0x2a2   : > { %v1561_v24 = vunpack.c.l.b16 %v1387_v36  ;;  %3619 = vpow2.f32 %v1982_v30  ;;  %v3458_v30 = vld [vmem:[#allocation2 + $0xb8] sm:$0xf0] }
 0x2a4   : > { %v1562_v31 = vpack.c.b16 %v1561_v24, %v1560_v22  ;;  %v1261_v10 = vpop.xlane.xlu0 %1260  ;;  %v1929_v43 = vpop.xlane.xlu1 %1928  ;;  %v3153_v22 = vld [vmem:[#allocation2 + $0x94] sm:$0xf]  ;;  %v3442_v24 = vld [vmem:[#allocation2 + $0xa8] sm:$0xf0] }
 0x2a5   : > { %v1277_v40 = vsub.f32 %v4177_v53, %v1261_v10  ;;  %v1969_v33 = vsub.f32 %v4172_v52, %v1929_v43  ;;  %v1923_v35 = vpop.xlane.xlu2 %1922  ;;  %v3461_v10 = vld [vmem:[#allocation2 + $0x148] sm:$0xf0]  ;;  %v3177_v43 = vld [vmem:[#allocation2 + $0x124] sm:$0xf]  ;;  %v3154_v21 = vor.u32 %v3442_v24, %v3153_v22 }
 0x2a6   : > { %v1967_v39 = vsub.f32 %v4175_v54, %v1923_v35  ;;  %3121 = vmatmul.msk.bf16.vlgmr.msrb.gmra.mxu2 %vm1213_vm0, %v1562_v31  ;;  %v3223_v31 = vld [vmem:[#allocation2 + $0x134] sm:$0xf] }
 0x2a7   : > { %v1308_v41 = vmul.f32 1.442695, %v1277_v40  ;;  %1885 = vmatpush.bf16.xpose.msrb.mxu2 %v3182_v37  ;;  %v1988_v44 = vmul.f32 1.442695, %v1969_v33  ;;  %v4268_v23 = vpop.eup %3617  ;;  %v3178_v40 = vor.u32 %v3445_v50, %v3177_v43  ;;  %v3209_v33 = vor.u32 %v3458_v30, %v3208_v28  ;;  %v3446_v37 = vld [vmem:[#allocation2 + $0x168] sm:$0xf0] }
 0x2a8   : > { %v1984_v12 = vmul.f32 1.442695, %v1967_v39  ;;  %v4270_v47 = vpop.eup %3619  ;;  %v1388_v54 = vpack.c.bf16 %v4268_v23, %v4268_v23  ;;  %v3224_v35 = vor.u32 %v3461_v10, %v3223_v31  ;;  %v3228_v39 = vld [vmem:[#allocation2 + $0x164] sm:$0xf] }
 0x2a9   : > { %3621 = vpow2.f32 %v1308_v41  ;;  %v2078_v48 = vpack.c.bf16 %v4270_v47, %v4270_v47  ;;  %v3462_v41 = vld [vmem:[#allocation2 + $0x178] sm:$0xf0] }
 0x2aa   : > { %3623 = vpow2.f32 %v1984_v12  ;;  %v1588_v57 = vunpack.c.l.b16 %v1388_v54  ;;  %v3185_v12 = vld [vmem:[#allocation2 + $0x154] sm:$0xf] }
 0x2ab   : > { %3625 = vpow2.f32 %v1988_v44  ;;  %v2096_v63 = vunpack.c.l.b16 %v2078_v48  ;;  %v3186_v44 = vor.u32 %v3446_v37, %v3185_v12  ;;  %v1313_v37 = vsel %vm1213_vm0, %v4193_v7, 0.0 }
 0x2ac   : > { %v1926_v45 = vpop.xlane.xlu0 %1925  ;;  %v1316_v12 = vsel %vm1213_vm0, %v4199_v26, 0.0  ;;  %v1322_v26 = vsel %vm1213_vm0, %v4210_v49, 0.0 }
 0x2ad   : > { %v1968_v52 = vsub.f32 %v4162_v38, %v1926_v45  ;;  %v3229_v45 = vor.u32 %v3462_v41, %v3228_v39 }
 0x2af   : > { %v4275_v53 = vpop.eup %3621  ;;  %v1986_v16 = vmul.f32 1.442695, %v1968_v52 }
 0x2b0   : > { %v1389_v51 = vpack.c.bf16 %v4275_v53, %v4275_v53  ;;  %v4281_v46 = vpop.eup %3623 }
 0x2b1   : > { %3627 = vpow2.f32 %v1986_v16  ;;  %v2079_v38 = vpack.c.bf16 %v4281_v46, %v4281_v46  ;;  %v4285_v62 = vpop.eup %3625 }
 0x2b2   : > { %v1589_v58 = vunpack.c.l.b16 %v1389_v51  ;;  %v2081_v29 = vpack.c.bf16 %v4285_v62, %v4285_v62  ;;  %v2023_v7 = vsel %vm1213_vm0, %v4285_v62, 0.0 }
 0x2b3   : > { %v2097_v18 = vunpack.c.l.b16 %v2079_v38 }
 0x2b4   : > { %v1590_v0 = vpack.c.b16 %v1589_v58, %v1588_v57  ;;  %v2125_v17 = vunpack.c.l.b16 %v2081_v29  ;;  %v4333_v29 = vpop.f32.mrf.mxu0 }
 0x2b5   : > { %v2098_v8 = vpack.c.b16 %v2097_v18, %v2096_v63 }
 0x2b6   : > { %3126 = vmatmul.msk.bf16.vlgmr.msrb.gmra.mxu3 %vm1213_vm0, %v1590_v0  ;;  %1782 = vmatmul.bf16.vlgmr.msra.gmra.mxu2 %v3146_v1 }
 0x2b7   : > { %v4290_v11 = vpop.eup %3627  ;;  %1911 = vmatpush.bf16.xpose.msrb.mxu3 %v3190_v5  ;;  %2171 = vmatpush.bf16.msra.mxu2 %v3204_v6 }
 0x2b8   : > { %v2080_v14 = vpack.c.bf16 %v4290_v11, %v4290_v11  ;;  %3195 = vmatmul.msk.bf16.vlgmr.msra.gmra.mxu0 %vm1213_vm0, %v2098_v8  ;;  %v4335_v8 = vpop.f32.mrf.mxu1 }
 0x2ba   : > { %v2124_v13 = vunpack.c.l.b16 %v2080_v14 }
 0x2bc   : > { %v2126_v36 = vpack.c.b16 %v2125_v17, %v2124_v13  ;;  %v1942_v17 = vsel %vm1213_vm0, %v4333_v29, -inf }
 0x2be   : > { %3200 = vmatmul.msk.bf16.vlgmr.msra.gmra.mxu1 %vm1213_vm0, %v2126_v36  ;;  %v4343_v36 = vpop.f32.mrf.mxu0 }
 0x2bf   : > { %v1945_v28 = vsel %vm1213_vm0, %v4343_v36, -inf }
 0x2c0   : > { %v4345_v50 = vpop.f32.mrf.mxu1 }
 0x2c1   : > { %v1951_v24 = vsel %vm1213_vm0, %v4345_v50, -inf }
 0x2c6   : > { %1808 = vmatmul.bf16.vlgmr.msra.gmra.mxu3 %v3154_v21  ;;  %1886 = vmatmul.bf16.vlgmr.msrb.gmra.mxu2 %v3178_v40  ;;  %v1948_v40 = vsel %vm1213_vm0, %v4335_v8, -inf }
 0x2c7   : > { %2199 = vmatpush.bf16.msra.mxu3 %v3209_v33  ;;  %2283 = vmatpush.bf16.msrb.mxu2 %v3224_v35 }
 0x2c9   : > { %v4296_v52 = vpop.f32.mrf.mxu2 }
 0x2d1   : > { %v4298_v54 = vpop.f32.mrf.mxu2 }
 0x2d6   : > { %1912 = vmatmul.bf16.vlgmr.msrb.gmra.mxu3 %v3186_v44  ;;  %v2014_v44 = vsel %vm1213_vm0, %v4270_v47, 0.0  ;;  %v1325_v47 = vsel %vm1213_vm0, %v4215_v55, 0.0  ;;  %v3484_v55 = vld [vmem:[#allocation9 + $0x28] sm:$0xff] }
 0x2d7   : > { %2311 = vmatpush.bf16.msrb.mxu3 %v3229_v45  ;;  %v1310_v45 = vsel %vm1213_vm0, %v4188_v2, 0.0  ;;  %v2020_v2 = vsel %vm1213_vm0, %v4290_v11, 0.0 }
 0x2d9   : > { %v4300_v16 = vpop.f32.mrf.mxu3 }
 0x2e1   : > { %v4304_v51 = vpop.f32.mrf.mxu3 }
 0x2e9   : > { %v4302_v48 = vpop.f32.mrf.mxu2 }
 0x2f1   : > { %v4306_v15 = vpop.f32.mrf.mxu2 }
 0x2f9   : > { %v4308_v25 = vpop.f32.mrf.mxu3 }
 0x301   : > { %v4312_v58 = vpop.f32.mrf.mxu3 }
 0x309   : > { %v4310_v57 = vpop.f32.mrf.mxu2 }
 0x311   : > { %v4314_v38 = vpop.f32.mrf.mxu2 }
 0x319   : > { %v4316_v59 = vpop.f32.mrf.mxu3 }
 0x321   : > { %v4320_v27 = vpop.f32.mrf.mxu3 }
 0x329   : > { %v4318_v61 = vpop.f32.mrf.mxu2 }
 0x331   : > { %v4322_v63 = vpop.f32.mrf.mxu2 }
 0x339   : > { %v4324_v0 = vpop.f32.mrf.mxu3  ;;  %v1783_v18 = vpop.f32.mrf.mxu2 }
 0x33a   : > { %v1930_v1 = vsel %vm1213_vm0, %v1783_v18, -inf }
 0x33b   : > { %1931 = vmax.xlane.f32.xlu2 %v1930_v1  ;;  %v1319_v1 = vsel %vm1213_vm0, %v4204_v32, 0.0  ;;  %v1328_v32 = vsel %vm1213_vm0, %v4221_v9, 0.0  ;;  %v3494_v9 = vld [vmem:[#allocation9 + $0x78] sm:$0xff] }
 0x33c   : > { %2643 = vmatpush.bf16.msra.mxu1 %v3494_v9 }
 0x341   : > { %v4327_v4 = vpop.f32.mrf.mxu3  ;;  %v4329_v5 = vpop.f32.mrf.mxu2 }
 0x342   : > { %v1933_v6 = vsel %vm1213_vm0, %v4329_v5, -inf }
 0x343   : > { %1934 = vmax.xlane.f32.xlu0 %v1933_v6  ;;  %v2017_v6 = vsel %vm1213_vm0, %v4281_v46, 0.0 }
 0x349   : > { %v4337_v14 = vpop.f32.mrf.mxu3  ;;  %v4355_v31 = vpop.f32.mrf.mxu2 }
 0x34a   : > { %v1936_v13 = vsel %vm1213_vm0, %v4337_v14, -inf  ;;  %v1954_v43 = vsel %vm1213_vm0, %v4355_v31, -inf }
 0x34b   : > { %1943 = vmax.xlane.f32.xlu0 %v1942_v17  ;;  %1937 = vmax.xlane.f32.xlu1 %v1936_v13  ;;  %v3486_v13 = vld [vmem:[#allocation9 + $0x38] sm:$0xff] }
 0x34c   : > { %2594 = vmatpush.bf16.msra.mxu0 %v3486_v13 }
 0x351   : > { %v4347_v22 = vpop.f32.mrf.mxu3  ;;  %v4365_v33 = vpop.f32.mrf.mxu2 }
 0x352   : > { %v1939_v30 = vsel %vm1213_vm0, %v4347_v22, -inf  ;;  %v1957_v41 = vsel %vm1213_vm0, %v4365_v33, -inf }
 0x353   : > { %1952 = vmax.xlane.f32.xlu0 %v1951_v24  ;;  %1946 = vmax.xlane.f32.xlu1 %v1945_v28 }
 0x354   : > { %1940 = vmax.xlane.f32.xlu2 %v1939_v30  ;;  %v3485_v30 = vld [vmem:[#allocation9 + $0x30] sm:$0xff] }
 0x355   : > { %2595 = vmatpush.bf16.msra.mxu0 %v3485_v30 }
 0x359   : > { %v4357_v10 = vpop.f32.mrf.mxu3  ;;  %2596 = vmatpush.bf16.msra.mxu0 %v3484_v55 }
 0x35a   : > { %v1960_v21 = vsel %vm1213_vm0, %v4357_v10, -inf }
 0x35b   : > { %1955 = vmax.xlane.f32.xlu1 %v1954_v43  ;;  %1961 = vmax.xlane.f32.xlu0 %v1960_v21 }
 0x35c   : > { %1949 = vmax.xlane.f32.xlu2 %v1948_v40 }
 0x361   : > { %v4367_v35 = vpop.f32.mrf.mxu3 }
 0x362   : > { %v1963_v39 = vsel %vm1213_vm0, %v4367_v35, -inf }
 0x363   : > { %1314 = vadd.xlane.f32.xlu0 %v1313_v37  ;;  %1964 = vmax.xlane.f32.xlu1 %v1963_v39 }
 0x364   : > { %1958 = vmax.xlane.f32.xlu2 %v1957_v41 }
 0x36b   : > { %1317 = vadd.xlane.f32.xlu0 %v1316_v12  ;;  %2015 = vadd.xlane.f32.xlu1 %v2014_v44  ;;  %v3483_v12 = vld [vmem:[#allocation9 + $0x20] sm:$0xff]  ;;  %v3493_v44 = vld [vmem:[#allocation9 + $0x70] sm:$0xff] }
 0x36c   : > { %1311 = vadd.xlane.f32.xlu2 %v1310_v45  ;;  %2597 = vmatpush.bf16.msra.mxu0 %v3483_v12 }
 0x36d   : > { %2644 = vmatpush.bf16.msra.mxu1 %v3493_v44 }
 0x373   : > { %2024 = vadd.xlane.f32.xlu0 %v2023_v7  ;;  %1320 = vadd.xlane.f32.xlu1 %v1319_v1  ;;  %v1331_v7 = vsel %vm1213_vm0, %v4226_v19, 0.0 }
 0x374   : > { %2018 = vadd.xlane.f32.xlu2 %v2017_v6 }
 0x37b   : > { %1323 = vadd.xlane.f32.xlu1 %v1322_v26 }
 0x37c   : > { %2021 = vadd.xlane.f32.xlu2 %v2020_v2  ;;  %v3482_v2 = vld [vmem:[#allocation9 + $0x18] sm:$0xff] }
 0x37d   : > { %2598 = vmatpush.bf16.msra.mxu0 %v3482_v2 }
 0x384   : > { %1326 = vadd.xlane.f32.xlu2 %v1325_v47 }
 0x38c   : > { %1329 = vadd.xlane.f32.xlu2 %v1328_v32 }
 0x3ae   : > { %v1932_v46 = vpop.xlane.xlu2 %1931 }
 0x3af   : > { %v1970_v62 = vsub.f32 %v1783_v18, %v1932_v46 }
 0x3b1   : > { %v1990_v17 = vmul.f32 1.442695, %v1970_v62 }
 0x3b3   : > { %3629 = vpow2.f32 %v1990_v17 }
 0x3b6   : > { %v1935_v24 = vpop.xlane.xlu0 %1934 }
 0x3b7   : > { %v1971_v49 = vsub.f32 %v4329_v5, %v1935_v24 }
 0x3b9   : > { %v3630_v11 = vpop.eup %3629  ;;  %v1992_v28 = vmul.f32 1.442695, %v1971_v49  ;;  %v3481_v49 = vld [vmem:[#allocation9 + $0x10] sm:$0xff] }
 0x3ba   : > { %v2026_v43 = vsel %vm1213_vm0, %v3630_v11, 0.0  ;;  %v2082_v37 = vpack.c.bf16 %v3630_v11, %v3630_v11  ;;  %v3491_v11 = vld [vmem:[#allocation9 + $0x60] sm:$0xff]  ;;  %2599 = vmatpush.bf16.msra.mxu0 %v3481_v49 }
 0x3bb   : > { %3631 = vpow2.f32 %v1992_v28  ;;  %2027 = vadd.xlane.f32.xlu0 %v2026_v43  ;;  %v1334_v43 = vsel %vm1213_vm0, %v4232_v34, 0.0 }
 0x3bc   : > { %v2152_v6 = vunpack.c.l.b16 %v2082_v37 }
 0x3be   : > { %v1944_v21 = vpop.xlane.xlu0 %1943  ;;  %v1938_v40 = vpop.xlane.xlu1 %1937 }
 0x3bf   : > { %v1972_v18 = vsub.f32 %v4337_v14, %v1938_v40  ;;  %v1974_v5 = vsub.f32 %v4333_v29, %v1944_v21  ;;  %v3492_v29 = vld [vmem:[#allocation9 + $0x68] sm:$0xff] }
 0x3c0   : > { %2645 = vmatpush.bf16.msra.mxu1 %v3492_v29 }
 0x3c1   : > { %v3632_v39 = vpop.eup %3631  ;;  %v1994_v41 = vmul.f32 1.442695, %v1972_v18  ;;  %v1998_v14 = vmul.f32 1.442695, %v1974_v5 }
 0x3c2   : > { %v2083_v45 = vpack.c.bf16 %v3632_v39, %v3632_v39  ;;  %v2029_v1 = vsel %vm1213_vm0, %v3632_v39, 0.0 }
 0x3c3   : > { %1332 = vadd.xlane.f32.xlu0 %v1331_v7  ;;  %2030 = vadd.xlane.f32.xlu1 %v2029_v1  ;;  %3633 = vpow2.f32 %v1994_v41  ;;  %v3479_v41 = vld [vmem:[#allocation9] sm:$0xff]  ;;  %v3489_v1 = vld [vmem:[#allocation9 + $0x50] sm:$0xff] }
 0x3c4   : > { %v2153_v26 = vunpack.c.l.b16 %v2083_v45  ;;  %3635 = vpow2.f32 %v1998_v14  ;;  %2646 = vmatpush.bf16.msra.mxu1 %v3491_v11 }
 0x3c6   : > { %v2154_v47 = vpack.c.b16 %v2153_v26, %v2152_v6  ;;  %v1953_v32 = vpop.xlane.xlu0 %1952  ;;  %v1947_v46 = vpop.xlane.xlu1 %1946 }
 0x3c7   : > { %v1975_v62 = vsub.f32 %v4343_v36, %v1947_v46  ;;  %v1941_v17 = vpop.xlane.xlu2 %1940  ;;  %v1977_v19 = vsub.f32 %v4345_v50, %v1953_v32  ;;  %v3480_v50 = vld [vmem:[#allocation9 + $0x8] sm:$0xff] }
 0x3c8   : > { %v1973_v13 = vsub.f32 %v4347_v22, %v1941_v17  ;;  %3205 = vmatmul.msk.bf16.vlgmr.msra.gmra.mxu2 %vm1213_vm0, %v2154_v47  ;;  %v3490_v22 = vld [vmem:[#allocation9 + $0x58] sm:$0xff]  ;;  %2600 = vmatpush.bf16.msra.mxu0 %v3480_v50  ;;  %v3487_v50 = vld [vmem:[#allocation9 + $0x40] sm:$0xff] }
 0x3c9   : > { %v2000_v24 = vmul.f32 1.442695, %v1975_v62  ;;  %v3634_v28 = vpop.eup %3633  ;;  %v2004_v55 = vmul.f32 1.442695, %v1977_v19  ;;  %2647 = vmatpush.bf16.msra.mxu1 %v3490_v22 }
 0x3ca   : > { %v1996_v30 = vmul.f32 1.442695, %v1973_v13  ;;  %v2032_v36 = vsel %vm1213_vm0, %v3634_v28, 0.0  ;;  %v3636_v9 = vpop.eup %3635  ;;  %v2084_v44 = vpack.c.bf16 %v3634_v28, %v3634_v28  ;;  %v3488_v13 = vld [vmem:[#allocation9 + $0x48] sm:$0xff] }
 0x3cb   : > { %1335 = vadd.xlane.f32.xlu0 %v1334_v43  ;;  %3637 = vpow2.f32 %v2000_v24  ;;  %2033 = vadd.xlane.f32.xlu1 %v2032_v36  ;;  %v2086_v39 = vpack.c.bf16 %v3636_v9, %v3636_v9 }
 0x3cc   : > { %3639 = vpow2.f32 %v1996_v30  ;;  %2601 = vmatpush.bf16.msra.mxu0 %v3479_v41  ;;  %v2180_v46 = vunpack.c.l.b16 %v2084_v44 }
 0x3cd   : > { %3641 = vpow2.f32 %v2004_v55  ;;  %v2208_v29 = vunpack.c.l.b16 %v2086_v39  ;;  %2648 = vmatpush.bf16.msra.mxu1 %v3489_v1 }
 0x3ce   : > { %v1956_v21 = vpop.xlane.xlu1 %1955  ;;  %v1962_v40 = vpop.xlane.xlu0 %1961 }
 0x3cf   : > { %v1950_v18 = vpop.xlane.xlu2 %1949  ;;  %v1980_v37 = vsub.f32 %v4357_v10, %v1962_v40  ;;  %v1978_v34 = vsub.f32 %v4355_v31, %v1956_v21  ;;  %v1337_v10 = vsel %vm1213_vm0, %v4237_v42, 0.0 }
 0x3d0   : > { %v1976_v5 = vsub.f32 %v4335_v8, %v1950_v18 }
 0x3d1   : > { %v3638_v12 = vpop.eup %3637  ;;  %v2010_v7 = vmul.f32 1.442695, %v1980_v37  ;;  %v2006_v31 = vmul.f32 1.442695, %v1978_v34  ;;  %2649 = vmatpush.bf16.msra.mxu1 %v3488_v13 }
 0x3d2   : > { %v2002_v45 = vmul.f32 1.442695, %v1976_v5  ;;  %v3640_v6 = vpop.eup %3639  ;;  %v2087_v26 = vpack.c.bf16 %v3638_v12, %v3638_v12  ;;  %v2041_v14 = vsel %vm1213_vm0, %v3638_v12, 0.0 }
 0x3d3   : > { %v2085_v2 = vpack.c.bf16 %v3640_v6, %v3640_v6  ;;  %v2035_v8 = vsel %vm1213_vm0, %v3640_v6, 0.0  ;;  %2042 = vadd.xlane.f32.xlu0 %v2041_v14  ;;  %1338 = vadd.xlane.f32.xlu1 %v1337_v10  ;;  %v3642_v32 = vpop.eup %3641  ;;  %v1349_v10 = vsel %vm1213_vm0, %v4259_v20, 0.0 }
 0x3d4   : > { %3643 = vpow2.f32 %v2002_v45  ;;  %v2209_v47 = vunpack.c.l.b16 %v2087_v26  ;;  %2036 = vadd.xlane.f32.xlu2 %v2035_v8  ;;  %v2089_v30 = vpack.c.bf16 %v3642_v32, %v3642_v32  ;;  %v4436_v26 = vpop.f32.mrf.mxu1 }
 0x3d5   : > { %v2181_v62 = vunpack.c.l.b16 %v2085_v2  ;;  %3645 = vpow2.f32 %v2010_v7  ;;  %2650 = vmatpush.bf16.msra.mxu1 %v3487_v50  ;;  %v2047_v2 = vsel %vm1213_vm0, %v3642_v32, 0.0 }
 0x3d6   : > { %v1315_v17 = vpop.xlane.xlu0 %1314  ;;  %v1965_v19 = vpop.xlane.xlu1 %1964  ;;  %v2210_v42 = vpack.c.b16 %v2209_v47, %v2208_v29  ;;  %v2237_v37 = vunpack.c.l.b16 %v2089_v30  ;;  %v1343_v47 = vsel %vm1213_vm0, %v4248_v60, 0.0 }
 0x3d7   : > { %v1959_v24 = vpop.xlane.xlu2 %1958  ;;  %3647 = vrcp.f32 %v1315_v17  ;;  %v1981_v49 = vsub.f32 %v4367_v35, %v1965_v19  ;;  %v2182_v11 = vpack.c.b16 %v2181_v62, %v2180_v46  ;;  %v1340_v35 = vsel %vm1213_vm0, %v4243_v56, 0.0 }
 0x3d8   : > { %3649 = vpow2.f32 %v2006_v31  ;;  %v1979_v28 = vsub.f32 %v4365_v33, %v1959_v24  ;;  %3215 = vmatmul.msk.bf16.vlgmr.msrb.gmra.mxu0 %vm1213_vm0, %v2210_v42  ;;  %v2038_v33 = vsel %vm1213_vm0, %v3636_v9, 0.0  ;;  %v2117_v31 = vpop.f32.mrf.mxu0 }
 0x3d9   : > { %v2012_v43 = vmul.f32 1.442695, %v1981_v49  ;;  %3210 = vmatmul.msk.bf16.vlgmr.msra.gmra.mxu3 %vm1213_vm0, %v2182_v11 }
 0x3da   : > { %v3644_v36 = vpop.eup %3643  ;;  %v2008_v55 = vmul.f32 1.442695, %v1979_v28 }
 0x3db   : > { %v2088_v22 = vpack.c.bf16 %v3644_v36, %v3644_v36  ;;  %3651 = vpow2.f32 %v2012_v43  ;;  %v2044_v21 = vsel %vm1213_vm0, %v3644_v36, 0.0  ;;  %v4423_v40 = vpop.eup %3645  ;;  %1341 = vadd.xlane.f32.xlu1 %v1340_v35 }
 0x3dc   : > { %3653 = vpow2.f32 %v2008_v55  ;;  %2045 = vadd.xlane.f32.xlu0 %v2044_v21  ;;  %2039 = vadd.xlane.f32.xlu2 %v2038_v33  ;;  %v2092_v56 = vpack.c.bf16 %v4423_v40, %v4423_v40 }
 0x3dd   : > { %v3648_v18 = vpop.eup %3647  ;;  %v2236_v34 = vunpack.c.l.b16 %v2088_v22  ;;  %v2147_v22 = vpop.f32.mrf.mxu1 }
 0x3de   : > { %v3650_v5 = vpop.eup %3649  ;;  %v1615_v39 = vmul.f32 %v3648_v18, %v4298_v54  ;;  %v1318_v41 = vpop.xlane.xlu0 %1317  ;;  %v2292_v8 = vunpack.c.l.b16 %v2092_v56 }
 0x3df   : > { %v2016_v12 = vpop.xlane.xlu1 %2015  ;;  %v2238_v44 = vpack.c.b16 %v2237_v37, %v2236_v34  ;;  %v1312_v45 = vpop.xlane.xlu2 %1311  ;;  %3655 = vrcp.f32 %v1318_v41  ;;  %v2090_v1 = vpack.c.bf16 %v3650_v5, %v3650_v5  ;;  %v2050_v55 = vsel %vm1213_vm0, %v3650_v5, 0.0 }
 0x3e0   : > { %v1631_v7 = vpack.c.bf16 %v1615_v39, %v1615_v39  ;;  %3657 = vrcp.f32 %v1312_v45  ;;  %v2119_v35 = vpop.f32.mrf.mxu0  ;;  %v1355_v45 = vsel %vm1213_vm0, %v4275_v53, 0.0 }
 0x3e1   : > { %v4429_v9 = vpop.eup %3651  ;;  %3659 = vrcp.f32 %v2016_v12  ;;  %3220 = vmatmul.msk.bf16.vlgmr.msrb.gmra.mxu1 %vm1213_vm0, %v2238_v44  ;;  %v2264_v62 = vunpack.c.l.b16 %v2090_v1 }
 0x3e2   : > { %v4432_v6 = vpop.eup %3653  ;;  %1647 = vst [vmem:[#allocation3 + $0x8] sm:$0xf] %v1631_v7  ;;  %v2093_v54 = vpack.c.bf16 %v4429_v9, %v4429_v9  ;;  %v2059_v56 = vsel %vm1213_vm0, %v4429_v9, 0.0 }
 0x3e3   : > { %v2091_v14 = vpack.c.bf16 %v4432_v6, %v4432_v6  ;;  %2048 = vadd.xlane.f32.xlu1 %v2047_v2  ;;  %v2053_v1 = vsel %vm1213_vm0, %v4432_v6, 0.0  ;;  %v2056_v6 = vsel %vm1213_vm0, %v4423_v40, 0.0 }
 0x3e4   : > { %v2293_v29 = vunpack.c.l.b16 %v2093_v54  ;;  %1350 = vadd.xlane.f32.xlu0 %v1349_v10  ;;  %1344 = vadd.xlane.f32.xlu2 %v1343_v47 }
 0x3e5   : > { %v3656_v46 = vpop.eup %3655  ;;  %v2265_v17 = vunpack.c.l.b16 %v2091_v14 }
 0x3e6   : > { %v3658_v19 = vpop.eup %3657  ;;  %v2294_v13 = vpack.c.b16 %v2293_v29, %v2292_v8  ;;  %v1616_v42 = vmul.f32 %v3656_v46, %v4300_v16  ;;  %v2025_v24 = vpop.xlane.xlu0 %2024  ;;  %v1352_v16 = vsel %vm1213_vm0, %v4268_v23, 0.0 }
 0x3e7   : > { %v1321_v20 = vpop.xlane.xlu1 %1320  ;;  %v3660_v49 = vpop.eup %3659  ;;  %v2266_v32 = vpack.c.b16 %v2265_v17, %v2264_v62  ;;  %v1614_v11 = vmul.f32 %v3658_v19, %v4296_v52  ;;  %3661 = vrcp.f32 %v2025_v24  ;;  %v1346_v52 = vsel %vm1213_vm0, %v4254_v3, 0.0 }
 0x3e8   : > { %v2019_v28 = vpop.xlane.xlu2 %2018  ;;  %v1632_v30 = vpack.c.bf16 %v1616_v42, %v1616_v42  ;;  %v2318_v60 = vmul.f32 %v3660_v49, %v2117_v31 }
 0x3e9   : > { %3663 = vrcp.f32 %v2019_v28  ;;  %v1630_v43 = vpack.c.bf16 %v1614_v11, %v1614_v11  ;;  %3225 = vmatmul.msk.bf16.vlgmr.msrb.gmra.mxu2 %vm1213_vm0, %v2266_v32  ;;  %3230 = vmatmul.msk.bf16.vlgmr.msrb.gmra.mxu3 %vm1213_vm0, %v2294_v13  ;;  %v3464_v44 = vld [vmem:[#allocation3 + $0x4] sm:$0xf0] }
 0x3ea   : > { %3665 = vrcp.f32 %v1321_v20  ;;  %1648 = vst [vmem:[#allocation3 + $0x10] sm:$0xf] %v1632_v30  ;;  %v2334_v36 = vpack.c.bf16 %v2318_v60, %v2318_v60 }
 0x3eb   : > { %1646 = vst [vmem:[#allocation3] sm:$0xf] %v1630_v43  ;;  %2051 = vadd.xlane.f32.xlu1 %v2050_v55 }
 0x3ec   : > { %2350 = vst [vmem:[#allocation3 + $0x4] sm:$0xf] %v2334_v36  ;;  %1353 = vadd.xlane.f32.xlu0 %v1352_v16  ;;  %1347 = vadd.xlane.f32.xlu2 %v1346_v52 }
 0x3ed   : > { %v3662_v50 = vpop.eup %3661 }
 0x3ee   : > { %v2321_v33 = vmul.f32 %v3662_v50, %v2147_v22 }
 0x3ef   : > { %v3664_v21 = vpop.eup %3663  ;;  %v1324_v18 = vpop.xlane.xlu1 %1323 }
 0x3f0   : > { %v3666_v37 = vpop.eup %3665  ;;  %v2319_v34 = vmul.f32 %v3664_v21, %v2119_v35  ;;  %v2022_v39 = vpop.xlane.xlu2 %2021  ;;  %3667 = vrcp.f32 %v1324_v18  ;;  %v2337_v23 = vpack.c.bf16 %v2321_v33, %v2321_v33 }
 0x3f1   : > { %v1617_v5 = vmul.f32 %v3666_v37, %v4304_v51  ;;  %3669 = vrcp.f32 %v2022_v39  ;;  %v3241_v17 = vld [vmem:[#allocation3 + $0x10] sm:$0xf] }
 0x3f2   : > { %v2335_v41 = vpack.c.bf16 %v2319_v34, %v2319_v34  ;;  %2353 = vst [vmem:[#allocation3 + $0x1c] sm:$0xf] %v2337_v23  ;;  %v3233_v12 = vld [vmem:[#allocation3] sm:$0xf] }
 0x3f3   : > { %v1633_v3 = vpack.c.bf16 %v1617_v5, %v1617_v5  ;;  %v3234_v7 = vor.u32 %v3464_v44, %v3233_v12  ;;  %1356 = vadd.xlane.f32.xlu1 %v1355_v45  ;;  %v3463_v9 = vld [vmem:[#allocation3 + $0x4] sm:$0xf] }
 0x3f4   : > { %2351 = vst [vmem:[#allocation3 + $0xc] sm:$0xf] %v2335_v41  ;;  %2060 = vadd.xlane.f32.xlu0 %v2059_v56  ;;  %2054 = vadd.xlane.f32.xlu2 %v2053_v1 }
 0x3f5   : > { %1649 = vst [vmem:[#allocation3 + $0x18] sm:$0xf] %v1633_v3  ;;  %2602 = vmatmul.bf16.vlgmr.msra.gmra.mxu0 %v3234_v7 }
 0x3f6   : > { %v3668_v51 = vpop.eup %3667 }
 0x3f7   : > { %v3670_v54 = vpop.eup %3669  ;;  %v1618_v14 = vmul.f32 %v3668_v51, %v4302_v48 }
 0x3f8   : > { %v2320_v10 = vmul.f32 %v3670_v54, %v4436_v26  ;;  %v1327_v2 = vpop.xlane.xlu2 %1326 }
 0x3f9   : > { %v1634_v53 = vpack.c.bf16 %v1618_v14, %v1618_v14  ;;  %3671 = vrcp.f32 %v1327_v2  ;;  %v3243_v49 = vld [vmem:[#allocation3 + $0x18] sm:$0xf0] }
 0x3fa   : > { %v2336_v31 = vpack.c.bf16 %v2320_v10, %v2320_v10 }
 0x3fb   : > { %1650 = vst [vmem:[#allocation3 + $0x20] sm:$0xf] %v1634_v53  ;;  %v3235_v8 = vld [vmem:[#allocation3 + $0x8] sm:$0xf0] }
 0x3fc   : > { %2352 = vst [vmem:[#allocation3 + $0x14] sm:$0xf] %v2336_v31  ;;  %v3238_v29 = vor.u32 %v3463_v9, %v3235_v8  ;;  %2057 = vadd.xlane.f32.xlu2 %v2056_v6  ;;  %v3466_v26 = vld [vmem:[#allocation3 + $0x14] sm:$0xf0] }
 0x3fd   : > { %v3242_v19 = vor.u32 %v3466_v26, %v3241_v17 }
 0x3fe   : > { %2651 = vmatmul.bf16.vlgmr.msra.gmra.mxu1 %v3238_v29 }
 0x3ff   : > { %v3672_v47 = vpop.eup %3671 }
 0x400   : > { %v1619_v46 = vmul.f32 %v3672_v47, %v4306_v15  ;;  %v1330_v48 = vpop.xlane.xlu2 %1329 }
 0x401   : > { %3673 = vrcp.f32 %v1330_v48 }
 0x402   : > { %v1635_v62 = vpack.c.bf16 %v1619_v46, %v1619_v46  ;;  %v3249_v11 = vld [vmem:[#allocation3 + $0x20] sm:$0xf] }
 0x403   : > { %v3465_v24 = vld [vmem:[#allocation3 + $0x14] sm:$0xf] }
 0x404   : > { %1651 = vst [vmem:[#allocation3 + $0x28] sm:$0xf] %v1635_v62  ;;  %v3246_v40 = vor.u32 %v3465_v24, %v3243_v49 }
 0x405   : > { %2607 = vmatmul.bf16.gmra.mxu0 %v3242_v19 }
 0x407   : > { %v3674_v13 = vpop.eup %3673 }
 0x408   : > { %v1620_v42 = vmul.f32 %v3674_v13, %v4308_v25 }
 0x40a   : > { %v1636_v20 = vpack.c.bf16 %v1620_v42, %v1620_v42 }
 0x40b   : > { %v3468_v32 = vld [vmem:[#allocation3 + $0x24] sm:$0xf0] }
 0x40c   : > { %1652 = vst [vmem:[#allocation3 + $0x30] sm:$0xf] %v1636_v20  ;;  %v3250_v15 = vor.u32 %v3468_v32, %v3249_v11 }
 0x40e   : > { %2656 = vmatmul.bf16.gmra.mxu1 %v3246_v40 }
 0x413   : > { %v3257_v18 = vld [vmem:[#allocation3 + $0x30] sm:$0xf] }
 0x415   : > { %2612 = vmatmul.bf16.gmra.mxu0 %v3250_v15 }
 0x42e   : > { %v2028_v28 = vpop.xlane.xlu0 %2027 }
 0x436   : > { %v1333_v30 = vpop.xlane.xlu0 %1332  ;;  %v2031_v60 = vpop.xlane.xlu1 %2030 }
 0x437   : > { %3675 = vrcp.f32 %v1333_v30 }
 0x43d   : > { %v3676_v43 = vpop.eup %3675 }
 0x43e   : > { %v1621_v36 = vmul.f32 %v3676_v43, %v4312_v58  ;;  %v1336_v16 = vpop.xlane.xlu0 %1335  ;;  %v2034_v25 = vpop.xlane.xlu1 %2033 }
 0x43f   : > { %3677 = vrcp.f32 %v1336_v16 }
 0x440   : > { %v1637_v55 = vpack.c.bf16 %v1621_v36, %v1621_v36  ;;  %3679 = vrcp.f32 %v2028_v28 }
 0x442   : > { %1653 = vst [vmem:[#allocation3 + $0x38] sm:$0xf] %v1637_v55 }
 0x445   : > { %v3678_v52 = vpop.eup %3677 }
 0x446   : > { %v1622_v50 = vmul.f32 %v3678_v52, %v4310_v57  ;;  %v2043_v22 = vpop.xlane.xlu0 %2042  ;;  %v1339_v21 = vpop.xlane.xlu1 %1338 }
 0x447   : > { %v2037_v33 = vpop.xlane.xlu2 %2036  ;;  %3681 = vrcp.f32 %v1339_v21  ;;  %v3680_v39 = vpop.eup %3679 }
 0x448   : > { %v1638_v35 = vpack.c.bf16 %v1622_v50, %v1622_v50  ;;  %3683 = vrcp.f32 %v2031_v60 }
 0x449   : > { %v3470_v37 = vld [vmem:[#allocation3 + $0x34] sm:$0xf0] }
 0x44a   : > { %1654 = vst [vmem:[#allocation3 + $0x40] sm:$0xf] %v1638_v35  ;;  %v3258_v34 = vor.u32 %v3470_v37, %v3257_v18 }
 0x44b   : > { %v2173_v58 = vpop.f32.mrf.mxu2 }
 0x44c   : > { %v2322_v23 = vmul.f32 %v3680_v39, %v2173_v58  ;;  %2617 = vmatmul.bf16.gmra.mxu0 %v3258_v34 }
 0x44d   : > { %v3682_v12 = vpop.eup %3681 }
 0x44e   : > { %v2338_v5 = vpack.c.bf16 %v2322_v23, %v2322_v23  ;;  %v1342_v3 = vpop.xlane.xlu1 %1341  ;;  %v1623_v44 = vmul.f32 %v3682_v12, %v4314_v38  ;;  %v3684_v45 = vpop.eup %3683 }
 0x44f   : > { %v2046_v41 = vpop.xlane.xlu0 %2045  ;;  %v2040_v57 = vpop.xlane.xlu2 %2039 }
 0x450   : > { %2354 = vst [vmem:[#allocation3 + $0x24] sm:$0xf] %v2338_v5  ;;  %3685 = vrcp.f32 %v2040_v57  ;;  %v1639_v56 = vpack.c.bf16 %v1623_v44, %v1623_v44 }
 0x451   : > { %3687 = vrcp.f32 %v1342_v3  ;;  %v3265_v46 = vld [vmem:[#allocation3 + $0x40] sm:$0xf] }
 0x452   : > { %3689 = vrcp.f32 %v2034_v25  ;;  %1655 = vst [vmem:[#allocation3 + $0x48] sm:$0xf] %v1639_v56 }
 0x453   : > { %v2175_v7 = vpop.f32.mrf.mxu2  ;;  %3691 = vrcp.f32 %v2043_v22 }
 0x454   : > { %v2323_v1 = vmul.f32 %v3684_v45, %v2175_v7  ;;  %3693 = vrcp.f32 %v2046_v41 }
 0x455   : > { %v2229_v54 = vpop.f32.mrf.mxu0 }
 0x456   : > { %v2339_v51 = vpack.c.bf16 %v2323_v1, %v2323_v1  ;;  %v3686_v14 = vpop.eup %3685  ;;  %v2049_v2 = vpop.xlane.xlu1 %2048 }
 0x457   : > { %v1351_v10 = vpop.xlane.xlu0 %1350  ;;  %v3688_v53 = vpop.eup %3687  ;;  %v2326_v31 = vmul.f32 %v3686_v14, %v2229_v54  ;;  %v3467_v15 = vld [vmem:[#allocation3 + $0x24] sm:$0xf] }
 0x458   : > { %2355 = vst [vmem:[#allocation3 + $0x2c] sm:$0xf] %v2339_v51  ;;  %v1345_v9 = vpop.xlane.xlu2 %1344  ;;  %3695 = vrcp.f32 %v1351_v10  ;;  %v1624_v38 = vmul.f32 %v3688_v53, %v4316_v59  ;;  %v3690_v29 = vpop.eup %3689 }
 0x459   : > { %3697 = vrcp.f32 %v1345_v9  ;;  %v2342_v8 = vpack.c.bf16 %v2326_v31, %v2326_v31  ;;  %v3692_v47 = vpop.eup %3691  ;;  %v3472_v48 = vld [vmem:[#allocation3 + $0x44] sm:$0xf0] }
 0x45a   : > { %v1640_v6 = vpack.c.bf16 %v1624_v38, %v1624_v38  ;;  %v3694_v26 = vpop.eup %3693  ;;  %v3266_v17 = vor.u32 %v3472_v48, %v3265_v46  ;;  %3699 = vrcp.f32 %v2037_v33 }
 0x45b   : > { %2358 = vst [vmem:[#allocation3 + $0x44] sm:$0xf] %v2342_v8  ;;  %3701 = vrcp.f32 %v2049_v2 }
 0x45c   : > { %1656 = vst [vmem:[#allocation3 + $0x50] sm:$0xf] %v1640_v6  ;;  %v2201_v62 = vpop.f32.mrf.mxu3  ;;  %2622 = vmatmul.bf16.gmra.mxu0 %v3266_v17  ;;  %v4479_v6 = vld [vmem:[%s4554_s3] ss:$0 sm:$0xff] }
 0x45d   : > { %v2324_v13 = vmul.f32 %v3690_v29, %v2201_v62  ;;  %v2231_v42 = vpop.f32.mrf.mxu0 }
 0x45e   : > { %v3696_v19 = vpop.eup %3695  ;;  %v2257_v24 = vpop.f32.mrf.mxu1  ;;  %v2327_v49 = vmul.f32 %v3692_v47, %v2231_v42 }
 0x45f   : > { %v3698_v20 = vpop.eup %3697  ;;  %v1627_v59 = vmul.f32 %v3696_v19, %v4322_v63  ;;  %v2328_v40 = vmul.f32 %v3694_v26, %v2257_v24  ;;  %v1354_v32 = vpop.xlane.xlu0 %1353  ;;  %v3251_v28 = vld [vmem:[#allocation3 + $0x28] sm:$0xf0]  ;;  %v2340_v60 = vpack.c.bf16 %v2324_v13, %v2324_v13 }
 0x460   : > { %v2052_v11 = vpop.xlane.xlu1 %2051  ;;  %v1625_v30 = vmul.f32 %v3698_v20, %v4320_v27  ;;  %v1348_v43 = vpop.xlane.xlu2 %1347  ;;  %3703 = vrcp.f32 %v1354_v32  ;;  %v3254_v36 = vor.u32 %v3467_v15, %v3251_v28  ;;  %v2343_v25 = vpack.c.bf16 %v2327_v49, %v2327_v49 }
 0x461   : > { %v1643_v16 = vpack.c.bf16 %v1627_v59, %v1627_v59  ;;  %3705 = vrcp.f32 %v1348_v43  ;;  %2356 = vst [vmem:[#allocation3 + $0x34] sm:$0xf] %v2340_v60  ;;  %v2344_v63 = vpack.c.bf16 %v2328_v40, %v2328_v40  ;;  %v3700_v52 = vpop.eup %3699 }
 0x462   : > { %v1641_v55 = vpack.c.bf16 %v1625_v30, %v1625_v30  ;;  %2661 = vmatmul.bf16.gmra.mxu1 %v3254_v36  ;;  %v3702_v50 = vpop.eup %3701  ;;  %2359 = vst [vmem:[#allocation3 + $0x4c] sm:$0xf] %v2343_v25  ;;  %3707 = vrcp.f32 %v2052_v11  ;;  %v3471_v15 = vld [vmem:[#allocation3 + $0x44] sm:$0xf] }
 0x463   : > { %1659 = vst [vmem:[#allocation3 + $0x68] sm:$0xf] %v1643_v16  ;;  %v3273_v12 = vld [vmem:[#allocation3 + $0x50] sm:$0xf] }
 0x464   : > { %1657 = vst [vmem:[#allocation3 + $0x58] sm:$0xf] %v1641_v55  ;;  %v2203_v22 = vpop.f32.mrf.mxu3 }
 0x465   : > { %2360 = vst [vmem:[#allocation3 + $0x54] sm:$0xf] %v2344_v63  ;;  %v2325_v27 = vmul.f32 %v3700_v52, %v2203_v22 }
 0x466   : > { %v3704_v21 = vpop.eup %3703  ;;  %v2259_v35 = vpop.f32.mrf.mxu1 }
 0x467   : > { %v3706_v33 = vpop.eup %3705  ;;  %v1628_v18 = vmul.f32 %v3704_v21, %v4324_v0  ;;  %v2329_v37 = vmul.f32 %v3702_v50, %v2259_v35  ;;  %v2341_v58 = vpack.c.bf16 %v2325_v27, %v2325_v27  ;;  %v2061_v45 = vpop.xlane.xlu0 %2060 }
 0x468   : > { %v1357_v34 = vpop.xlane.xlu1 %1356  ;;  %v1626_v39 = vmul.f32 %v3706_v33, %v4318_v61  ;;  %v2055_v23 = vpop.xlane.xlu2 %2054  ;;  %v3469_v10 = vld [vmem:[#allocation3 + $0x34] sm:$0xf] }
 0x469   : > { %v1644_v5 = vpack.c.bf16 %v1628_v18, %v1628_v18  ;;  %v2345_v41 = vpack.c.bf16 %v2329_v37, %v2329_v37  ;;  %2357 = vst [vmem:[#allocation3 + $0x3c] sm:$0xf] %v2341_v58  ;;  %3709 = vrcp.f32 %v1357_v34  ;;  %v3708_v44 = vpop.eup %3707  ;;  %v3267_v32 = vld [vmem:[#allocation3 + $0x48] sm:$0xf0] }
 0x46a   : > { %v1642_v3 = vpack.c.bf16 %v1626_v39, %v1626_v39  ;;  %3711 = vrcp.f32 %v2055_v23  ;;  %v3476_v49 = vld [vmem:[#allocation3 + $0x64] sm:$0xf0]  ;;  %v3270_v30 = vor.u32 %v3471_v15, %v3267_v32 }
 0x46b   : > { %1660 = vst [vmem:[#allocation3 + $0x70] sm:$0xf] %v1644_v5  ;;  %v3474_v57 = vld [vmem:[#allocation3 + $0x54] sm:$0xf0]  ;;  %3713 = vrcp.f32 %v2061_v45 }
 0x46c   : > { %1658 = vst [vmem:[#allocation3 + $0x60] sm:$0xf] %v1642_v3  ;;  %v2285_v56 = vpop.f32.mrf.mxu2  ;;  %v3274_v7 = vor.u32 %v3474_v57, %v3273_v12  ;;  %v2313_v1 = vpop.f32.mrf.mxu3  ;;  %v3473_v27 = vld [vmem:[#allocation3 + $0x54] sm:$0xf] }
 0x46d   : > { %2361 = vst [vmem:[#allocation3 + $0x5c] sm:$0xf] %v2345_v41  ;;  %v2330_v0 = vmul.f32 %v3708_v44, %v2285_v56 }
 0x46e   : > { %2627 = vmatmul.bf16.gmra.mxu0 %v3274_v7 }
 0x46f   : > { %v2346_v61 = vpack.c.bf16 %v2330_v0, %v2330_v0  ;;  %v3710_v51 = vpop.eup %3709 }
 0x470   : > { %v2058_v54 = vpop.xlane.xlu2 %2057  ;;  %v1629_v14 = vmul.f32 %v3710_v51, %v4327_v4  ;;  %v3259_v2 = vld [vmem:[#allocation3 + $0x38] sm:$0xf0]  ;;  %v3712_v38 = vpop.eup %3711 }
 0x471   : > { %2362 = vst [vmem:[#allocation3 + $0x64] sm:$0xf] %v2346_v61  ;;  %3715 = vrcp.f32 %v2058_v54  ;;  %v3262_v31 = vor.u32 %v3469_v10, %v3259_v2  ;;  %v3714_v29 = vpop.eup %3713 }
 0x472   : > { %v2603_v53 = vpop.f32.mrf.mxu0  ;;  %v1645_v9 = vpack.c.bf16 %v1629_v14, %v1629_v14  ;;  %v3289_v63 = vld [vmem:[#allocation3 + $0x70] sm:$0xf] }
 0x473   : > { %2666 = vmatmul.bf16.gmra.mxu1 %v3262_v31  ;;  %v2604_v19 = vadd.f32 %v4479_v6, %v2603_v53  ;;  %v3281_v20 = vld [vmem:[#allocation3 + $0x60] sm:$0xf] }
 0x474   : > { %v2287_v8 = vpop.f32.mrf.mxu2  ;;  %1661 = vst [vmem:[#allocation3 + $0x78] sm:$0xf] %v1645_v9  ;;  %v2315_v46 = vpop.f32.mrf.mxu3  ;;  %v3282_v40 = vor.u32 %v3476_v49, %v3281_v20  ;;  %v3275_v22 = vld [vmem:[#allocation3 + $0x58] sm:$0xf0] }
 0x475   : > { %v2331_v47 = vmul.f32 %v3712_v38, %v2287_v8  ;;  %v2333_v4 = vmul.f32 %v3714_v29, %v2315_v46  ;;  %v3278_v33 = vor.u32 %v3473_v27, %v3275_v22 }
 0x477   : > { %v3716_v48 = vpop.eup %3715  ;;  %v2347_v26 = vpack.c.bf16 %v2331_v47, %v2331_v47  ;;  %v2349_v17 = vpack.c.bf16 %v2333_v4, %v2333_v4 }
 0x478   : > { %v2332_v62 = vmul.f32 %v3716_v48, %v2313_v1  ;;  %v3475_v34 = vld [vmem:[#allocation3 + $0x64] sm:$0xf] }
 0x479   : > { %2363 = vst [vmem:[#allocation3 + $0x6c] sm:$0xf] %v2347_v26 }
 0x47a   : > { %v2348_v13 = vpack.c.bf16 %v2332_v62, %v2332_v62  ;;  %2365 = vst [vmem:[#allocation3 + $0x7c] sm:$0xf] %v2349_v17  ;;  %v2605_v42 = vpop.f32.mrf.mxu0 }
 0x47b   : > { %v2652_v24 = vpop.f32.mrf.mxu1  ;;  %v2606_v11 = vadd.f32 %v4479_v6, %v2605_v42  ;;  %v3478_v25 = vld [vmem:[#allocation3 + $0x74] sm:$0xf0] }
 0x47c   : > { %v2653_v59 = vadd.f32 %v2652_v24, %v2604_v19  ;;  %2364 = vst [vmem:[#allocation3 + $0x74] sm:$0xf] %v2348_v13  ;;  %v3290_v52 = vor.u32 %v3478_v25, %v3289_v63 }
 0x47e   : > { %2692 = vst [vmem:[%s4484_s6] sm:$0xff] %v2653_v59  ;;  %2632 = vmatmul.bf16.gmra.mxu0 %v3282_v40 }
 0x480   : > { %v3283_v37 = vld [vmem:[#allocation3 + $0x68] sm:$0xf0] }
 0x481   : > { %v3286_v39 = vor.u32 %v3475_v34, %v3283_v37  ;;  %v3291_v23 = vld [vmem:[#allocation3 + $0x78] sm:$0xf0] }
 0x482   : > { %v2608_v43 = vpop.f32.mrf.mxu0 }
 0x483   : > { %v2654_v28 = vpop.f32.mrf.mxu1  ;;  %2671 = vmatmul.bf16.gmra.mxu1 %v3270_v30  ;;  %v2609_v36 = vadd.f32 %v4479_v6, %v2608_v43  ;;  %v3477_v58 = vld [vmem:[#allocation3 + $0x74] sm:$0xf] }
 0x484   : > { %v2655_v60 = vadd.f32 %v2654_v28, %v2606_v11  ;;  %v3294_v5 = vor.u32 %v3477_v58, %v3291_v23 }
 0x486   : > { %2693 = vst [vmem:[%s4484_s6 + $0x8] sm:$0xff] %v2655_v60 }
 0x48a   : > { %v2610_v50 = vpop.f32.mrf.mxu0 }
 0x48b   : > { %v2657_v16 = vpop.f32.mrf.mxu1  ;;  %v2611_v21 = vadd.f32 %v4479_v6, %v2610_v50 }
 0x48c   : > { %v2658_v55 = vadd.f32 %v2657_v16, %v2609_v36 }
 0x48e   : > { %2694 = vst [vmem:[%s4484_s6 + $0x10] sm:$0xff] %v2658_v55  ;;  %2637 = vmatmul.bf16.gmra.mxu0 %v3290_v52 }
 0x492   : > { %v2613_v41 = vpop.f32.mrf.mxu0 }
 0x493   : > { %v2659_v35 = vpop.f32.mrf.mxu1  ;;  %2676 = vmatmul.bf16.gmra.mxu1 %v3278_v33  ;;  %v2614_v57 = vadd.f32 %v4479_v6, %v2613_v41 }
 0x494   : > { %v2660_v18 = vadd.f32 %v2659_v35, %v2611_v21 }
 0x496   : > { %2695 = vst [vmem:[%s4484_s6 + $0x18] sm:$0xff] %v2660_v18 }
 0x49a   : > { %v2615_v3 = vpop.f32.mrf.mxu0 }
 0x49b   : > { %v2616_v7 = vadd.f32 %v4479_v6, %v2615_v3 }
 0x4a3   : > { %2681 = vmatmul.bf16.gmra.mxu1 %v3286_v39 }
 0x4b3   : > { %2686 = vmatmul.bf16.gmra.mxu1 %v3294_v5 }
 0x4c9   : > { %v2618_v12 = vpop.f32.mrf.mxu0 }
 0x4ca   : > { %v2619_v51 = vadd.f32 %v4479_v6, %v2618_v12 }
 0x4d1   : > { %v2620_v56 = vpop.f32.mrf.mxu0 }
 0x4d2   : > { %v2621_v10 = vadd.f32 %v4479_v6, %v2620_v56 }
 0x4d9   : > { %v2623_v61 = vpop.f32.mrf.mxu0 }
 0x4da   : > { %v2624_v9 = vadd.f32 %v4479_v6, %v2623_v61 }
 0x4df   : > { %v2662_v44 = vpop.f32.mrf.mxu1 }
 0x4e0   : > { %v2663_v45 = vadd.f32 %v2662_v44, %v2614_v57 }
 0x4e1   : > { %v2625_v2 = vpop.f32.mrf.mxu0 }
 0x4e2   : > { %2696 = vst [vmem:[%s4484_s6 + $0x20] sm:$0xff] %v2663_v45  ;;  %v2626_v47 = vadd.f32 %v4479_v6, %v2625_v2 }
 0x4e7   : > { %v2664_v0 = vpop.f32.mrf.mxu1 }
 0x4e8   : > { %v2665_v1 = vadd.f32 %v2664_v0, %v2616_v7 }
 0x4ea   : > { %2697 = vst [vmem:[%s4484_s6 + $0x28] sm:$0xff] %v2665_v1 }
 0x4eb   : > { %v2628_v29 = vpop.f32.mrf.mxu0 }
 0x4ec   : > { %v2629_v26 = vadd.f32 %v4479_v6, %v2628_v29 }
 0x4f0   : > { %v2667_v54 = vpop.f32.mrf.mxu1 }
 0x4f1   : > { %v2668_v14 = vadd.f32 %v2667_v54, %v2619_v51 }
 0x4f3   : > { %2698 = vst [vmem:[%s4484_s6 + $0x30] sm:$0xff] %v2668_v14  ;;  %v2630_v48 = vpop.f32.mrf.mxu0 }
 0x4f4   : > { %v2631_v13 = vadd.f32 %v4479_v6, %v2630_v48 }
 0x4f8   : > { %v2669_v53 = vpop.f32.mrf.mxu1 }
 0x4f9   : > { %v2670_v31 = vadd.f32 %v2669_v53, %v2621_v10 }
 0x4fb   : > { %2699 = vst [vmem:[%s4484_s6 + $0x38] sm:$0xff] %v2670_v31  ;;  %v2633_v19 = vpop.f32.mrf.mxu0 }
 0x4fc   : > { %v2634_v20 = vadd.f32 %v4479_v6, %v2633_v19 }
 0x500   : > { %v2672_v38 = vpop.f32.mrf.mxu1 }
 0x501   : > { %v2673_v8 = vadd.f32 %v2672_v38, %v2624_v9 }
 0x503   : > { %2700 = vst [vmem:[%s4484_s6 + $0x40] sm:$0xff] %v2673_v8  ;;  %v2635_v59 = vpop.f32.mrf.mxu0 }
 0x504   : > { %v2636_v32 = vadd.f32 %v4479_v6, %v2635_v59 }
 0x508   : > { %v2674_v46 = vpop.f32.mrf.mxu1 }
 0x509   : > { %v2675_v4 = vadd.f32 %v2674_v46, %v2626_v47 }
 0x50b   : > { %2701 = vst [vmem:[%s4484_s6 + $0x48] sm:$0xff] %v2675_v4  ;;  %v2638_v28 = vpop.f32.mrf.mxu0 }
 0x50c   : > { %v2639_v30 = vadd.f32 %v4479_v6, %v2638_v28 }
 0x510   : > { %v2677_v62 = vpop.f32.mrf.mxu1 }
 0x511   : > { %v2678_v17 = vadd.f32 %v2677_v62, %v2629_v26 }
 0x513   : > { %2702 = vst [vmem:[%s4484_s6 + $0x50] sm:$0xff] %v2678_v17  ;;  %v2640_v36 = vpop.f32.mrf.mxu0 }
 0x514   : > { %v2641_v16 = vadd.f32 %v4479_v6, %v2640_v36 }
 0x518   : > { %v2679_v42 = vpop.f32.mrf.mxu1 }
 0x519   : > { %v2680_v24 = vadd.f32 %v2679_v42, %v2631_v13 }
 0x51b   : > { %2703 = vst [vmem:[%s4484_s6 + $0x58] sm:$0xff] %v2680_v24 }
 0x520   : > { %v2682_v49 = vpop.f32.mrf.mxu1 }
 0x521   : > { %v2683_v40 = vadd.f32 %v2682_v49, %v2634_v20 }
 0x523   : > { %2704 = vst [vmem:[%s4484_s6 + $0x60] sm:$0xff] %v2683_v40 }
 0x528   : > { %v2684_v11 = vpop.f32.mrf.mxu1 }
 0x529   : > { %v2685_v15 = vadd.f32 %v2684_v11, %v2636_v32 }
 0x52b   : > { %2705 = vst [vmem:[%s4484_s6 + $0x68] sm:$0xff] %v2685_v15 }
 0x530   : > { %v2687_v60 = vpop.f32.mrf.mxu1 }
 0x531   : > { %v2688_v43 = vadd.f32 %v2687_v60, %v2639_v30 }
 0x533   : > { %2706 = vst [vmem:[%s4484_s6 + $0x70] sm:$0xff] %v2688_v43 }
 0x538   : > { %v2689_v25 = vpop.f32.mrf.mxu1 }
 0x539   : > { %v2690_v55 = vadd.f32 %v2689_v25, %v2641_v16 }
 0x53b   : > { %2707 = vst [vmem:[%s4484_s6 + $0x78] sm:$0xff] %v2690_v55 }
 0x53c   : > { %3834 = shalt.err (!%p3831_p10)
}
 0x53d   : > { %s3887_s30 = smov 128   ;;  %s3888_s21 = smov 8  }
 0x53e   : > { %3523 = dma.vmem_to_hbm [thread:$0]  (%p3983_p5), %s2723_s14, 2048, %s2725_s25, %s2709_s27, %s3887_s30, %s3887_s30, %s3888_s21  }
 0x53f PF: > { %s2739_s26 = sand.u32 1, %s3865_s15   ;;  %p4561_p12 = scmp.ge.s32.totalorder %s3877_s18, 2 }
 0x540   : > { %s2740_s6 = scalar_lea.sflag [#allocation6], %s2739_s26 }
 0x541   : > { %p3537_p13 = pnand %p4561_p12, %p3949_p6 }
 0x543   : > { %p3538_p0 = pneg %p3537_p13 }
 0x545   : > { %3860 = dma.done.wait (%p3538_p0), %s2740_s6, 2048  }
 0x546   : > { %3862 = vsyncadd (%p3538_p0), %s2740_s6, 4294965248  ;;  %p18_p3 = scmp.ge.s32.totalorder %s3970_s12, 4   ;;  %s4562_s15 = smov %s3869_s16 }
 0x547   : > { %s4563_s16 = smov %s3873_s17  ;;  %s4564_s17 = smov %s3979_s20 }
 0x548   : > { %s4565_s18 = smov %s3970_s12  ;;  %20 = sbr.rel (!%p18_p3) target bundleno = 6 (0x6), region = 89 }
 0x54d   :  { %2746 = vsyncpa [#allocation5], 1 }
 0x54e   :  { %2748 = vsyncpa [#allocation5 + $0x1], 1 }
 0x54f   :  { %2749 = vsyncpa [#allocation8], 1 }
 0x550   :  { %2750 = vsyncpa [#allocation6], 1 }
 0x551   :  { %2752 = vsyncpa [#allocation6 + $0x1], 1 }

</bundles_post_ra>
